<compile_context>
chip_gen: v7x
topology: tpu7x:2x2x1
jax: 0.10.0
libtpu: 0.0.40
codegen_flags: <defaults>
</compile_context>

<pallas_src>
import functools

import jax
import jax.numpy as jnp
from jax.experimental import pallas as pl
from jax.experimental.pallas import tpu as pltpu


def _layernorm(v, g, b, eps=1e-5):
    mu = jnp.mean(v, axis=-1, keepdims=True)
    var = jnp.mean((v - mu) ** 2, axis=-1, keepdims=True)
    return (v - mu) * jax.lax.rsqrt(var + eps) * g + b


def encoder_kernel(x_ref, wA_ref, w2_ref, vec_ref, out_ref,
                   *, num_layers, batch, seq, num_heads):
    f32 = jnp.float32
    B, S, H = batch, seq, num_heads
    BS, D = out_ref.shape
    hd = D // H

    def layer(l, state):
        # ---- packed per-layer parameters (3 reads, static sub-slices) ----------
        wA = wA_ref[l]                        # (D, 8D) = [Wqkv | Wo | W1]
        w2 = w2_ref[l]                        # (4D, D)
        vec = vec_ref[l]                      # (8, 4D), every row starts at lane 0

        wqkv = wA[:, 0:3 * D]                 # (D, 3D) per-head [q|k|v] blocks, q pre-scaled
        wo = wA[:, 3 * D:4 * D]               # (D, D)
        w1 = wA[:, 4 * D:8 * D]               # (D, 4D)

        ln1_g = vec[0:1, 0:D]
        ln1_b = vec[1:2, 0:D]
        ln2_g = vec[2:3, 0:D]
        ln2_b = vec[3:4, 0:D]
        bo = vec[4:5, 0:D]
        b2 = vec[5:6, 0:D]
        bqkv = vec[6:7, 0:3 * D]              # (1, 3D), q part pre-scaled
        b1 = vec[7:8, :]                      # (1, 4D)

        # ---- pre-LN + multi-head self-attention --------------------------------
        h = _layernorm(state, ln1_g, ln1_b)                                # (BS, D)

        # Single MXU matmul for Q/K/V of every head: (BS, D) @ (D, 3D).
        qkv = jnp.dot(h, wqkv, preferred_element_type=f32) + bqkv          # (BS, 3D)

        # Head split: per-head lane slice + leading-axis concat -> batch g = h*B + b.
        qkv_g = jnp.concatenate(
            [qkv[:, hh * 3 * hd:(hh + 1) * 3 * hd].reshape(B, S, 3 * hd)
             for hh in range(H)], axis=0)                                  # (H*B, S, 3hd)
        q = qkv_g[:, :, 0:hd]                 # scale already folded into packed weights
        k = qkv_g[:, :, hd:2 * hd]
        v = qkv_g[:, :, 2 * hd:3 * hd]

        # Batched attention over g = (head, batch); no per-head unrolled attention body.
        s = jnp.einsum('gqd,gkd->gqk', q, k, preferred_element_type=f32)   # (H*B, S, S)
        s = s - jnp.max(s, axis=-1, keepdims=True)
        p = jnp.exp(s)
        p = p / jnp.sum(p, axis=-1, keepdims=True)                         # exact softmax
        o = jnp.einsum('gqk,gkd->gqd', p, v, preferred_element_type=f32)   # (H*B, S, hd)

        # Out-projection: head hh hits rows [hh*hd:(hh+1)*hd] of Wo; accumulate.
        # (H=4 -> 3 vreg adds; switch to concat-heads @ Wo once H*hd grows.)
        attn = jnp.dot(o[0:B].reshape(BS, hd), wo[0:hd, :],
                       preferred_element_type=f32)
        for hh in range(1, H):
            attn = attn + jnp.dot(o[hh * B:(hh + 1) * B].reshape(BS, hd),
                                  wo[hh * hd:(hh + 1) * hd, :],
                                  preferred_element_type=f32)
        attn = attn + bo

        h1 = state + attn                                                  # residual 1

        # ---- pre-LN + MLP -------------------------------------------------------
        z = _layernorm(h1, ln2_g, ln2_b)
        z = jnp.maximum(jnp.dot(z, w1, preferred_element_type=f32) + b1, 0.0)
        z = jnp.dot(z, w2, preferred_element_type=f32) + b2
        return h1 + z                                                      # residual 2

    state = jax.lax.fori_loop(0, num_layers, layer,
                              x_ref[...].astype(f32), unroll=True)
    out_ref[...] = state.astype(out_ref.dtype)


def _pack_params(layer_params, num_heads):
    """Coalesce + stack per-layer params into 3 arrays with a leading [L] axis.

    Returns:
      wA  (L, D, 8D): [Wqkv | Wo | W1], Wqkv in per-head [q|k|v] column blocks with the
                      1/sqrt(hd) scale folded into the q columns.
      w2  (L, 4D, D)
      vec (L, 8, 4D): rows = ln1_g, ln1_b, ln2_g, ln2_b, bo, b2, bqkv(pad), b1.
    """
    wA_l, w2_l, vec_l = [], [], []
    for prm in layer_params:
        (ln1_g, ln1_b, wq, bq, wk, bk, wv, bv, wo, bo,
         ln2_g, ln2_b, w1, b1, w2, b2) = prm
        D = wq.shape[0]
        H = num_heads
        hd = D // H
        d4 = 4 * D
        scale = 1.0 / (float(hd) ** 0.5)

        qkv_cols, bqkv_cols = [], []
        for h in range(H):
            sl = slice(h * hd, (h + 1) * hd)
            qkv_cols += [wq[:, sl] * scale, wk[:, sl], wv[:, sl]]
            bqkv_cols += [bq[:, sl] * scale, bk[:, sl], bv[:, sl]]
        wqkv = jnp.concatenate(qkv_cols, axis=1)                    # (D, 3D)
        bqkv = jnp.concatenate(bqkv_cols, axis=1)                   # (1, 3D)

        wA_l.append(jnp.concatenate([wqkv, wo, w1], axis=1))        # (D, 8D)
        w2_l.append(w2)                                             # (4D, D)

        def row(v):
            v = v.reshape(1, -1)
            return jnp.pad(v, ((0, 0), (0, d4 - v.shape[1])))
        vec_l.append(jnp.concatenate(
            [row(ln1_g), row(ln1_b), row(ln2_g), row(ln2_b),
             row(bo), row(b2), row(bqkv), row(b1)], axis=0))        # (8, 4D)

    return jnp.stack(wA_l), jnp.stack(w2_l), jnp.stack(vec_l)


def residual_encoder(x, layer_params, num_heads):
    B, S, D = x.shape
    L = len(layer_params)
    wA, w2, vec = _pack_params(layer_params, num_heads)
    x2 = x.reshape(B * S, D)

    kernel = functools.partial(
        encoder_kernel, num_layers=L, batch=B, seq=S, num_heads=num_heads)

    # Single grid step: each input is one whole-array VMEM block (~106 KiB total),
    # the layer loop runs inside the kernel.  Use a grid=(L,) weight-streamed layout
    # only when the stacked weights stop fitting VMEM (large-model / v7x case).
    out = pl.pallas_call(
        kernel,
        grid=(1,),
        in_specs=[
            pl.BlockSpec((B * S, D), lambda i: (0, 0)),
            pl.BlockSpec(wA.shape, lambda i: (0, 0, 0)),
            pl.BlockSpec(w2.shape, lambda i: (0, 0, 0)),
            pl.BlockSpec(vec.shape, lambda i: (0, 0, 0)),
        ],
        out_specs=pl.BlockSpec((B * S, D), lambda i: (0, 0)),
        out_shape=jax.ShapeDtypeStruct((B * S, D), x.dtype),
        compiler_params=pltpu.CompilerParams(
            dimension_semantics=("arbitrary",)),
    )(x2, wA, w2, vec)
    return out.reshape(B, S, D)


# ---------------- deterministic synthetic parameter init ----------------------
def init_block_params(key, d_model):
    d4 = d_model * 4
    ks = jax.random.split(key, 7)
    std = 0.02
    f32 = jnp.float32

    ln1_g = jnp.ones((1, d_model), f32)
    ln1_b = jnp.zeros((1, d_model), f32)
    wq = jax.random.normal(ks[0], (d_model, d_model), f32) * std
    wk = jax.random.normal(ks[1], (d_model, d_model), f32) * std
    wv = jax.random.normal(ks[2], (d_model, d_model), f32) * std
    bq = jnp.zeros((1, d_model), f32)
    bk = jnp.zeros((1, d_model), f32)
    bv = jnp.zeros((1, d_model), f32)
    wo = jax.random.normal(ks[3], (d_model, d_model), f32) * std
    bo = jnp.zeros((1, d_model), f32)
    ln2_g = jnp.ones((1, d_model), f32)
    ln2_b = jnp.zeros((1, d_model), f32)
    w1 = jax.random.normal(ks[4], (d_model, d4), f32) * std
    b1 = jax.random.normal(ks[5], (1, d4), f32) * std
    w2 = jax.random.normal(ks[6], (d4, d_model), f32) * std
    b2 = jnp.zeros((1, d_model), f32)
    return (ln1_g, ln1_b, wq, bq, wk, bk, wv, bv, wo, bo,
            ln2_g, ln2_b, w1, b1, w2, b2)


# ---------------- pure-JAX reference (same math, for sanity check) ------------
def ref_block(x, params, num_heads):
    (ln1_g, ln1_b, wq, bq, wk, bk, wv, bv, wo, bo,
     ln2_g, ln2_b, w1, b1, w2, b2) = params
    B, S, D = x.shape
    hd = D // num_heads
    scale = 1.0 / (float(hd) ** 0.5)

    h = _layernorm(x, ln1_g, ln1_b)
    q = h @ wq + bq
    k = h @ wk + bk
    v = h @ wv + bv
    q = q.reshape(B, S, num_heads, hd).transpose(0, 2, 1, 3)
    k = k.reshape(B, S, num_heads, hd).transpose(0, 2, 1, 3)
    v = v.reshape(B, S, num_heads, hd).transpose(0, 2, 1, 3)
    s = jnp.einsum('bhqd,bhkd->bhqk', q, k) * scale
    p = jax.nn.softmax(s, axis=-1)
    o = jnp.einsum('bhqk,bhkd->bhqd', p, v)
    o = o.transpose(0, 2, 1, 3).reshape(B, S, D)
    h1 = x + (o @ wo + bo)
    z = _layernorm(h1, ln2_g, ln2_b)
    z = jnp.maximum(z @ w1 + b1, 0.0)
    z = z @ w2 + b2
    return h1 + z


if __name__ == "__main__":
    d_model, num_layers, num_heads = 32, 2, 4
    B, S = 2, 8

    key = jax.random.PRNGKey(0)
    kx, kp = jax.random.split(key)
    x = jax.random.normal(kx, (B, S, d_model), jnp.float32)

    layer_keys = jax.random.split(kp, num_layers)
    layer_params = [init_block_params(k, d_model) for k in layer_keys]

    out = residual_encoder(x, layer_params, num_heads)
    out = jax.block_until_ready(out)

    # pure-JAX reference at full f32 matmul precision
    with jax.default_matmul_precision("highest"):
        ref = x
        for p in layer_params:
            ref = ref_block(ref, p, num_heads)
        ref = jax.block_until_ready(ref)

    assert out.shape == (B, S, d_model)
    # Exact softmax now; remaining tolerance covers MXU f32 multi-pass rounding
    # differences between the in-kernel matmuls and the XLA reference.
    assert jnp.allclose(out, ref, atol=1e-3, rtol=1e-3), "mismatch vs reference"

    print("KERNEL_OK")
</pallas_src>

<mosaic_0001>
module attributes {stable_mosaic.version = 11 : i64} {
  func.func @encoder_kernel(%arg0: i32, %arg1: memref<16x32xf32, #tpu.memory_space<vmem>>, %arg2: memref<2x32x256xf32, #tpu.memory_space<vmem>>, %arg3: memref<2x128x32xf32, #tpu.memory_space<vmem>>, %arg4: memref<2x8x128xf32, #tpu.memory_space<vmem>>, %arg5: memref<16x32xf32, #tpu.memory_space<vmem>>) attributes {dimension_semantics = [#tpu.dimension_semantics<arbitrary>], iteration_bounds = array<i64: 1>, scalar_prefetch = 0 : i64, scratch_operands = 0 : i64, tpu.core_type = #tpu.core_type<tc>, window_params = [{pipeline_mode = #tpu.pipeline_mode<synchronous>, transform_indices = @transform_0, window_bounds = array<i64: 16, 32>}, {pipeline_mode = #tpu.pipeline_mode<synchronous>, transform_indices = @transform_1, window_bounds = array<i64: 2, 32, 256>}, {pipeline_mode = #tpu.pipeline_mode<synchronous>, transform_indices = @transform_2, window_bounds = array<i64: 2, 128, 32>}, {pipeline_mode = #tpu.pipeline_mode<synchronous>, transform_indices = @transform_3, window_bounds = array<i64: 2, 8, 128>}, {pipeline_mode = #tpu.pipeline_mode<synchronous>, transform_indices = @transform_4, window_bounds = array<i64: 16, 32>}]} {
    %c0 = arith.constant 0 : index
    %c0_0 = arith.constant 0 : index
    %0 = vector.load %arg1[%c0, %c0_0] : memref<16x32xf32, #tpu.memory_space<vmem>>, vector<16x32xf32>
    %c0_i32 = arith.constant 0 : i32
    %1 = arith.index_cast %c0_i32 : i32 to index
    %c0_1 = arith.constant 0 : index
    %c0_2 = arith.constant 0 : index
    %2 = vector.load %arg2[%1, %c0_1, %c0_2] : memref<2x32x256xf32, #tpu.memory_space<vmem>>, vector<1x32x256xf32>
    %3 = vector.shape_cast %2 : vector<1x32x256xf32> to vector<32x256xf32>
    %4 = arith.index_cast %c0_i32 : i32 to index
    %c0_3 = arith.constant 0 : index
    %c0_4 = arith.constant 0 : index
    %5 = vector.load %arg3[%4, %c0_3, %c0_4] : memref<2x128x32xf32, #tpu.memory_space<vmem>>, vector<1x128x32xf32>
    %6 = vector.shape_cast %5 : vector<1x128x32xf32> to vector<128x32xf32>
    %7 = arith.index_cast %c0_i32 : i32 to index
    %c0_5 = arith.constant 0 : index
    %c0_6 = arith.constant 0 : index
    %8 = vector.load %arg4[%7, %c0_5, %c0_6] : memref<2x8x128xf32, #tpu.memory_space<vmem>>, vector<1x8x128xf32>
    %9 = vector.shape_cast %8 : vector<1x8x128xf32> to vector<8x128xf32>
    %10 = vector.extract_strided_slice %3 {offsets = [0, 0], sizes = [32, 96], strides = [1, 1]} : vector<32x256xf32> to vector<32x96xf32>
    %11 = vector.extract_strided_slice %3 {offsets = [0, 96], sizes = [32, 32], strides = [1, 1]} : vector<32x256xf32> to vector<32x32xf32>
    %12 = vector.extract_strided_slice %3 {offsets = [0, 128], sizes = [32, 128], strides = [1, 1]} : vector<32x256xf32> to vector<32x128xf32>
    %13 = vector.extract_strided_slice %9 {offsets = [0, 0], sizes = [1, 32], strides = [1, 1]} : vector<8x128xf32> to vector<1x32xf32>
    %14 = vector.extract_strided_slice %9 {offsets = [1, 0], sizes = [1, 32], strides = [1, 1]} : vector<8x128xf32> to vector<1x32xf32>
    %15 = vector.extract_strided_slice %9 {offsets = [2, 0], sizes = [1, 32], strides = [1, 1]} : vector<8x128xf32> to vector<1x32xf32>
    %16 = vector.extract_strided_slice %9 {offsets = [3, 0], sizes = [1, 32], strides = [1, 1]} : vector<8x128xf32> to vector<1x32xf32>
    %17 = vector.extract_strided_slice %9 {offsets = [4, 0], sizes = [1, 32], strides = [1, 1]} : vector<8x128xf32> to vector<1x32xf32>
    %18 = vector.extract_strided_slice %9 {offsets = [5, 0], sizes = [1, 32], strides = [1, 1]} : vector<8x128xf32> to vector<1x32xf32>
    %19 = vector.extract_strided_slice %9 {offsets = [6, 0], sizes = [1, 96], strides = [1, 1]} : vector<8x128xf32> to vector<1x96xf32>
    %20 = vector.extract_strided_slice %9 {offsets = [7, 0], sizes = [1, 128], strides = [1, 1]} : vector<8x128xf32> to vector<1x128xf32>
    %cst = arith.constant dense<0.000000e+00> : vector<16xf32>
    %21 = vector.multi_reduction <add>, %0, %cst [1] : vector<16x32xf32> to vector<16xf32>
    %22 = vector.shape_cast %21 : vector<16xf32> to vector<16x1xf32>
    %cst_7 = arith.constant 3.200000e+01 : f32
    %23 = vector.broadcast %cst_7 : f32 to vector<16x1xf32>
    %24 = arith.divf %22, %23 : vector<16x1xf32>
    %25 = vector.broadcast %24 : vector<16x1xf32> to vector<16x32xf32>
    %26 = arith.subf %0, %25 : vector<16x32xf32>
    %27 = arith.mulf %26, %26 : vector<16x32xf32>
    %cst_8 = arith.constant dense<0.000000e+00> : vector<16xf32>
    %28 = vector.multi_reduction <add>, %27, %cst_8 [1] : vector<16x32xf32> to vector<16xf32>
    %29 = vector.shape_cast %28 : vector<16xf32> to vector<16x1xf32>
    %cst_9 = arith.constant 3.200000e+01 : f32
    %30 = vector.broadcast %cst_9 : f32 to vector<16x1xf32>
    %31 = arith.divf %29, %30 : vector<16x1xf32>
    %32 = vector.broadcast %24 : vector<16x1xf32> to vector<16x32xf32>
    %33 = arith.subf %0, %32 : vector<16x32xf32>
    %cst_10 = arith.constant 9.99999974E-6 : f32
    %34 = vector.broadcast %cst_10 : f32 to vector<16x1xf32>
    %35 = arith.addf %31, %34 : vector<16x1xf32>
    %36 = math.rsqrt %35 : vector<16x1xf32>
    %37 = vector.broadcast %36 : vector<16x1xf32> to vector<16x32xf32>
    %38 = arith.mulf %33, %37 : vector<16x32xf32>
    %39 = vector.broadcast %13 : vector<1x32xf32> to vector<16x32xf32>
    %40 = arith.mulf %38, %39 : vector<16x32xf32>
    %41 = vector.broadcast %14 : vector<1x32xf32> to vector<16x32xf32>
    %42 = arith.addf %40, %41 : vector<16x32xf32>
    %cst_11 = arith.constant dense<0.000000e+00> : vector<16x96xf32>
    %43 = tpu.matmul %42, %10, %cst_11 {dimension_numbers = #tpu.dot_dimension_numbers<[1], [0], [0], [1], [0, 0, 1, 1], [], []>} : vector<16x32xf32>, vector<32x96xf32>, vector<16x96xf32> -> vector<16x96xf32>
    %44 = vector.broadcast %19 : vector<1x96xf32> to vector<16x96xf32>
    %45 = arith.addf %43, %44 : vector<16x96xf32>
    %46 = vector.extract_strided_slice %45 {offsets = [0, 0], sizes = [16, 24], strides = [1, 1]} : vector<16x96xf32> to vector<16x24xf32>
    %47 = vector.shape_cast %46 : vector<16x24xf32> to vector<2x8x24xf32>
    %48 = vector.extract_strided_slice %45 {offsets = [0, 24], sizes = [16, 24], strides = [1, 1]} : vector<16x96xf32> to vector<16x24xf32>
    %49 = vector.shape_cast %48 : vector<16x24xf32> to vector<2x8x24xf32>
    %50 = vector.extract_strided_slice %45 {offsets = [0, 48], sizes = [16, 24], strides = [1, 1]} : vector<16x96xf32> to vector<16x24xf32>
    %51 = vector.shape_cast %50 : vector<16x24xf32> to vector<2x8x24xf32>
    %52 = vector.extract_strided_slice %45 {offsets = [0, 72], sizes = [16, 24], strides = [1, 1]} : vector<16x96xf32> to vector<16x24xf32>
    %53 = vector.shape_cast %52 : vector<16x24xf32> to vector<2x8x24xf32>
    %54 = tpu.concatenate %47, %49, %51, %53 in 0 : vector<2x8x24xf32>, vector<2x8x24xf32>, vector<2x8x24xf32>, vector<2x8x24xf32> -> vector<8x8x24xf32>
    %55 = vector.extract_strided_slice %54 {offsets = [0, 0, 0], sizes = [8, 8, 8], strides = [1, 1, 1]} : vector<8x8x24xf32> to vector<8x8x8xf32>
    %56 = vector.extract_strided_slice %54 {offsets = [0, 0, 8], sizes = [8, 8, 8], strides = [1, 1, 1]} : vector<8x8x24xf32> to vector<8x8x8xf32>
    %57 = vector.extract_strided_slice %54 {offsets = [0, 0, 16], sizes = [8, 8, 8], strides = [1, 1, 1]} : vector<8x8x24xf32> to vector<8x8x8xf32>
    "tpu.trace_start"() <{level = 10 : i32, message = "gqd,gkd->gqk"}> : () -> ()
    %cst_12 = arith.constant dense<0.000000e+00> : vector<8x8x8xf32>
    %58 = tpu.matmul %55, %56, %cst_12 {dimension_numbers = #tpu.dot_dimension_numbers<[2], [2], [1], [1], [0, 0, 0, 1, 1, 1], [0], [0]>} : vector<8x8x8xf32>, vector<8x8x8xf32>, vector<8x8x8xf32> -> vector<8x8x8xf32>
    "tpu.trace_stop"() : () -> ()
    %cst_13 = arith.constant dense<0xFF800000> : vector<8x8xf32>
    %59 = vector.multi_reduction <maximumf>, %58, %cst_13 [2] : vector<8x8x8xf32> to vector<8x8xf32>
    %60 = vector.shape_cast %59 : vector<8x8xf32> to vector<8x8x1xf32>
    %61 = vector.broadcast %60 : vector<8x8x1xf32> to vector<8x8x8xf32>
    %62 = arith.subf %58, %61 : vector<8x8x8xf32>
    %63 = math.exp %62 : vector<8x8x8xf32>
    %cst_14 = arith.constant dense<0.000000e+00> : vector<8x8xf32>
    %64 = vector.multi_reduction <add>, %63, %cst_14 [2] : vector<8x8x8xf32> to vector<8x8xf32>
    %65 = vector.shape_cast %64 : vector<8x8xf32> to vector<8x8x1xf32>
    %66 = vector.broadcast %65 : vector<8x8x1xf32> to vector<8x8x8xf32>
    %67 = arith.divf %63, %66 : vector<8x8x8xf32>
    "tpu.trace_start"() <{level = 10 : i32, message = "gqk,gkd->gqd"}> : () -> ()
    %cst_15 = arith.constant dense<0.000000e+00> : vector<8x8x8xf32>
    %68 = tpu.matmul %67, %57, %cst_15 {dimension_numbers = #tpu.dot_dimension_numbers<[2], [1], [1], [2], [0, 0, 0, 1, 1, 2], [0], [0]>} : vector<8x8x8xf32>, vector<8x8x8xf32>, vector<8x8x8xf32> -> vector<8x8x8xf32>
    "tpu.trace_stop"() : () -> ()
    %69 = vector.extract_strided_slice %68 {offsets = [0, 0, 0], sizes = [2, 8, 8], strides = [1, 1, 1]} : vector<8x8x8xf32> to vector<2x8x8xf32>
    %70 = vector.shape_cast %69 : vector<2x8x8xf32> to vector<16x8xf32>
    %71 = vector.extract_strided_slice %11 {offsets = [0, 0], sizes = [8, 32], strides = [1, 1]} : vector<32x32xf32> to vector<8x32xf32>
    %cst_16 = arith.constant dense<0.000000e+00> : vector<16x32xf32>
    %72 = tpu.matmul %70, %71, %cst_16 {dimension_numbers = #tpu.dot_dimension_numbers<[1], [0], [0], [1], [0, 0, 1, 1], [], []>} : vector<16x8xf32>, vector<8x32xf32>, vector<16x32xf32> -> vector<16x32xf32>
    %73 = vector.extract_strided_slice %68 {offsets = [2, 0, 0], sizes = [2, 8, 8], strides = [1, 1, 1]} : vector<8x8x8xf32> to vector<2x8x8xf32>
    %74 = vector.shape_cast %73 : vector<2x8x8xf32> to vector<16x8xf32>
    %75 = vector.extract_strided_slice %11 {offsets = [8, 0], sizes = [8, 32], strides = [1, 1]} : vector<32x32xf32> to vector<8x32xf32>
    %cst_17 = arith.constant dense<0.000000e+00> : vector<16x32xf32>
    %76 = tpu.matmul %74, %75, %cst_17 {dimension_numbers = #tpu.dot_dimension_numbers<[1], [0], [0], [1], [0, 0, 1, 1], [], []>} : vector<16x8xf32>, vector<8x32xf32>, vector<16x32xf32> -> vector<16x32xf32>
    %77 = arith.addf %72, %76 : vector<16x32xf32>
    %78 = vector.extract_strided_slice %68 {offsets = [4, 0, 0], sizes = [2, 8, 8], strides = [1, 1, 1]} : vector<8x8x8xf32> to vector<2x8x8xf32>
    %79 = vector.shape_cast %78 : vector<2x8x8xf32> to vector<16x8xf32>
    %80 = vector.extract_strided_slice %11 {offsets = [16, 0], sizes = [8, 32], strides = [1, 1]} : vector<32x32xf32> to vector<8x32xf32>
    %cst_18 = arith.constant dense<0.000000e+00> : vector<16x32xf32>
    %81 = tpu.matmul %79, %80, %cst_18 {dimension_numbers = #tpu.dot_dimension_numbers<[1], [0], [0], [1], [0, 0, 1, 1], [], []>} : vector<16x8xf32>, vector<8x32xf32>, vector<16x32xf32> -> vector<16x32xf32>
    %82 = arith.addf %77, %81 : vector<16x32xf32>
    %83 = vector.extract_strided_slice %68 {offsets = [6, 0, 0], sizes = [2, 8, 8], strides = [1, 1, 1]} : vector<8x8x8xf32> to vector<2x8x8xf32>
    %84 = vector.shape_cast %83 : vector<2x8x8xf32> to vector<16x8xf32>
    %85 = vector.extract_strided_slice %11 {offsets = [24, 0], sizes = [8, 32], strides = [1, 1]} : vector<32x32xf32> to vector<8x32xf32>
    %cst_19 = arith.constant dense<0.000000e+00> : vector<16x32xf32>
    %86 = tpu.matmul %84, %85, %cst_19 {dimension_numbers = #tpu.dot_dimension_numbers<[1], [0], [0], [1], [0, 0, 1, 1], [], []>} : vector<16x8xf32>, vector<8x32xf32>, vector<16x32xf32> -> vector<16x32xf32>
    %87 = arith.addf %82, %86 : vector<16x32xf32>
    %88 = vector.broadcast %17 : vector<1x32xf32> to vector<16x32xf32>
    %89 = arith.addf %87, %88 : vector<16x32xf32>
    %90 = arith.addf %0, %89 : vector<16x32xf32>
    %cst_20 = arith.constant dense<0.000000e+00> : vector<16xf32>
    %91 = vector.multi_reduction <add>, %90, %cst_20 [1] : vector<16x32xf32> to vector<16xf32>
    %92 = vector.shape_cast %91 : vector<16xf32> to vector<16x1xf32>
    %cst_21 = arith.constant 3.200000e+01 : f32
    %93 = vector.broadcast %cst_21 : f32 to vector<16x1xf32>
    %94 = arith.divf %92, %93 : vector<16x1xf32>
    %95 = vector.broadcast %94 : vector<16x1xf32> to vector<16x32xf32>
    %96 = arith.subf %90, %95 : vector<16x32xf32>
    %97 = arith.mulf %96, %96 : vector<16x32xf32>
    %cst_22 = arith.constant dense<0.000000e+00> : vector<16xf32>
    %98 = vector.multi_reduction <add>, %97, %cst_22 [1] : vector<16x32xf32> to vector<16xf32>
    %99 = vector.shape_cast %98 : vector<16xf32> to vector<16x1xf32>
    %cst_23 = arith.constant 3.200000e+01 : f32
    %100 = vector.broadcast %cst_23 : f32 to vector<16x1xf32>
    %101 = arith.divf %99, %100 : vector<16x1xf32>
    %102 = vector.broadcast %94 : vector<16x1xf32> to vector<16x32xf32>
    %103 = arith.subf %90, %102 : vector<16x32xf32>
    %cst_24 = arith.constant 9.99999974E-6 : f32
    %104 = vector.broadcast %cst_24 : f32 to vector<16x1xf32>
    %105 = arith.addf %101, %104 : vector<16x1xf32>
    %106 = math.rsqrt %105 : vector<16x1xf32>
    %107 = vector.broadcast %106 : vector<16x1xf32> to vector<16x32xf32>
    %108 = arith.mulf %103, %107 : vector<16x32xf32>
    %109 = vector.broadcast %15 : vector<1x32xf32> to vector<16x32xf32>
    %110 = arith.mulf %108, %109 : vector<16x32xf32>
    %111 = vector.broadcast %16 : vector<1x32xf32> to vector<16x32xf32>
    %112 = arith.addf %110, %111 : vector<16x32xf32>
    %cst_25 = arith.constant dense<0.000000e+00> : vector<16x128xf32>
    %113 = tpu.matmul %112, %12, %cst_25 {dimension_numbers = #tpu.dot_dimension_numbers<[1], [0], [0], [1], [0, 0, 1, 1], [], []>} : vector<16x32xf32>, vector<32x128xf32>, vector<16x128xf32> -> vector<16x128xf32>
    %114 = vector.broadcast %20 : vector<1x128xf32> to vector<16x128xf32>
    %115 = arith.addf %113, %114 : vector<16x128xf32>
    %cst_26 = arith.constant 0.000000e+00 : f32
    %116 = vector.broadcast %cst_26 : f32 to vector<16x128xf32>
    %117 = arith.maximumf %115, %116 : vector<16x128xf32>
    %cst_27 = arith.constant dense<0.000000e+00> : vector<16x32xf32>
    %118 = tpu.matmul %117, %6, %cst_27 {dimension_numbers = #tpu.dot_dimension_numbers<[1], [0], [0], [1], [0, 0, 1, 1], [], []>} : vector<16x128xf32>, vector<128x32xf32>, vector<16x32xf32> -> vector<16x32xf32>
    %119 = vector.broadcast %18 : vector<1x32xf32> to vector<16x32xf32>
    %120 = arith.addf %118, %119 : vector<16x32xf32>
    %121 = arith.addf %90, %120 : vector<16x32xf32>
    %c1_i32 = arith.constant 1 : i32
    %122 = arith.index_cast %c1_i32 : i32 to index
    %c0_28 = arith.constant 0 : index
    %c0_29 = arith.constant 0 : index
    %123 = vector.load %arg2[%122, %c0_28, %c0_29] : memref<2x32x256xf32, #tpu.memory_space<vmem>>, vector<1x32x256xf32>
    %124 = vector.shape_cast %123 : vector<1x32x256xf32> to vector<32x256xf32>
    %125 = arith.index_cast %c1_i32 : i32 to index
    %c0_30 = arith.constant 0 : index
    %c0_31 = arith.constant 0 : index
    %126 = vector.load %arg3[%125, %c0_30, %c0_31] : memref<2x128x32xf32, #tpu.memory_space<vmem>>, vector<1x128x32xf32>
    %127 = vector.shape_cast %126 : vector<1x128x32xf32> to vector<128x32xf32>
    %128 = arith.index_cast %c1_i32 : i32 to index
    %c0_32 = arith.constant 0 : index
    %c0_33 = arith.constant 0 : index
    %129 = vector.load %arg4[%128, %c0_32, %c0_33] : memref<2x8x128xf32, #tpu.memory_space<vmem>>, vector<1x8x128xf32>
    %130 = vector.shape_cast %129 : vector<1x8x128xf32> to vector<8x128xf32>
    %131 = vector.extract_strided_slice %124 {offsets = [0, 0], sizes = [32, 96], strides = [1, 1]} : vector<32x256xf32> to vector<32x96xf32>
    %132 = vector.extract_strided_slice %124 {offsets = [0, 96], sizes = [32, 32], strides = [1, 1]} : vector<32x256xf32> to vector<32x32xf32>
    %133 = vector.extract_strided_slice %124 {offsets = [0, 128], sizes = [32, 128], strides = [1, 1]} : vector<32x256xf32> to vector<32x128xf32>
    %134 = vector.extract_strided_slice %130 {offsets = [0, 0], sizes = [1, 32], strides = [1, 1]} : vector<8x128xf32> to vector<1x32xf32>
    %135 = vector.extract_strided_slice %130 {offsets = [1, 0], sizes = [1, 32], strides = [1, 1]} : vector<8x128xf32> to vector<1x32xf32>
    %136 = vector.extract_strided_slice %130 {offsets = [2, 0], sizes = [1, 32], strides = [1, 1]} : vector<8x128xf32> to vector<1x32xf32>
    %137 = vector.extract_strided_slice %130 {offsets = [3, 0], sizes = [1, 32], strides = [1, 1]} : vector<8x128xf32> to vector<1x32xf32>
    %138 = vector.extract_strided_slice %130 {offsets = [4, 0], sizes = [1, 32], strides = [1, 1]} : vector<8x128xf32> to vector<1x32xf32>
    %139 = vector.extract_strided_slice %130 {offsets = [5, 0], sizes = [1, 32], strides = [1, 1]} : vector<8x128xf32> to vector<1x32xf32>
    %140 = vector.extract_strided_slice %130 {offsets = [6, 0], sizes = [1, 96], strides = [1, 1]} : vector<8x128xf32> to vector<1x96xf32>
    %141 = vector.extract_strided_slice %130 {offsets = [7, 0], sizes = [1, 128], strides = [1, 1]} : vector<8x128xf32> to vector<1x128xf32>
    %cst_34 = arith.constant dense<0.000000e+00> : vector<16xf32>
    %142 = vector.multi_reduction <add>, %121, %cst_34 [1] : vector<16x32xf32> to vector<16xf32>
    %143 = vector.shape_cast %142 : vector<16xf32> to vector<16x1xf32>
    %cst_35 = arith.constant 3.200000e+01 : f32
    %144 = vector.broadcast %cst_35 : f32 to vector<16x1xf32>
    %145 = arith.divf %143, %144 : vector<16x1xf32>
    %146 = vector.broadcast %145 : vector<16x1xf32> to vector<16x32xf32>
    %147 = arith.subf %121, %146 : vector<16x32xf32>
    %148 = arith.mulf %147, %147 : vector<16x32xf32>
    %cst_36 = arith.constant dense<0.000000e+00> : vector<16xf32>
    %149 = vector.multi_reduction <add>, %148, %cst_36 [1] : vector<16x32xf32> to vector<16xf32>
    %150 = vector.shape_cast %149 : vector<16xf32> to vector<16x1xf32>
    %cst_37 = arith.constant 3.200000e+01 : f32
    %151 = vector.broadcast %cst_37 : f32 to vector<16x1xf32>
    %152 = arith.divf %150, %151 : vector<16x1xf32>
    %153 = vector.broadcast %145 : vector<16x1xf32> to vector<16x32xf32>
    %154 = arith.subf %121, %153 : vector<16x32xf32>
    %cst_38 = arith.constant 9.99999974E-6 : f32
    %155 = vector.broadcast %cst_38 : f32 to vector<16x1xf32>
    %156 = arith.addf %152, %155 : vector<16x1xf32>
    %157 = math.rsqrt %156 : vector<16x1xf32>
    %158 = vector.broadcast %157 : vector<16x1xf32> to vector<16x32xf32>
    %159 = arith.mulf %154, %158 : vector<16x32xf32>
    %160 = vector.broadcast %134 : vector<1x32xf32> to vector<16x32xf32>
    %161 = arith.mulf %159, %160 : vector<16x32xf32>
    %162 = vector.broadcast %135 : vector<1x32xf32> to vector<16x32xf32>
    %163 = arith.addf %161, %162 : vector<16x32xf32>
    %cst_39 = arith.constant dense<0.000000e+00> : vector<16x96xf32>
    %164 = tpu.matmul %163, %131, %cst_39 {dimension_numbers = #tpu.dot_dimension_numbers<[1], [0], [0], [1], [0, 0, 1, 1], [], []>} : vector<16x32xf32>, vector<32x96xf32>, vector<16x96xf32> -> vector<16x96xf32>
    %165 = vector.broadcast %140 : vector<1x96xf32> to vector<16x96xf32>
    %166 = arith.addf %164, %165 : vector<16x96xf32>
    %167 = vector.extract_strided_slice %166 {offsets = [0, 0], sizes = [16, 24], strides = [1, 1]} : vector<16x96xf32> to vector<16x24xf32>
    %168 = vector.shape_cast %167 : vector<16x24xf32> to vector<2x8x24xf32>
    %169 = vector.extract_strided_slice %166 {offsets = [0, 24], sizes = [16, 24], strides = [1, 1]} : vector<16x96xf32> to vector<16x24xf32>
    %170 = vector.shape_cast %169 : vector<16x24xf32> to vector<2x8x24xf32>
    %171 = vector.extract_strided_slice %166 {offsets = [0, 48], sizes = [16, 24], strides = [1, 1]} : vector<16x96xf32> to vector<16x24xf32>
    %172 = vector.shape_cast %171 : vector<16x24xf32> to vector<2x8x24xf32>
    %173 = vector.extract_strided_slice %166 {offsets = [0, 72], sizes = [16, 24], strides = [1, 1]} : vector<16x96xf32> to vector<16x24xf32>
    %174 = vector.shape_cast %173 : vector<16x24xf32> to vector<2x8x24xf32>
    %175 = tpu.concatenate %168, %170, %172, %174 in 0 : vector<2x8x24xf32>, vector<2x8x24xf32>, vector<2x8x24xf32>, vector<2x8x24xf32> -> vector<8x8x24xf32>
    %176 = vector.extract_strided_slice %175 {offsets = [0, 0, 0], sizes = [8, 8, 8], strides = [1, 1, 1]} : vector<8x8x24xf32> to vector<8x8x8xf32>
    %177 = vector.extract_strided_slice %175 {offsets = [0, 0, 8], sizes = [8, 8, 8], strides = [1, 1, 1]} : vector<8x8x24xf32> to vector<8x8x8xf32>
    %178 = vector.extract_strided_slice %175 {offsets = [0, 0, 16], sizes = [8, 8, 8], strides = [1, 1, 1]} : vector<8x8x24xf32> to vector<8x8x8xf32>
    "tpu.trace_start"() <{level = 10 : i32, message = "gqd,gkd->gqk"}> : () -> ()
    %cst_40 = arith.constant dense<0.000000e+00> : vector<8x8x8xf32>
    %179 = tpu.matmul %176, %177, %cst_40 {dimension_numbers = #tpu.dot_dimension_numbers<[2], [2], [1], [1], [0, 0, 0, 1, 1, 1], [0], [0]>} : vector<8x8x8xf32>, vector<8x8x8xf32>, vector<8x8x8xf32> -> vector<8x8x8xf32>
    "tpu.trace_stop"() : () -> ()
    %cst_41 = arith.constant dense<0xFF800000> : vector<8x8xf32>
    %180 = vector.multi_reduction <maximumf>, %179, %cst_41 [2] : vector<8x8x8xf32> to vector<8x8xf32>
    %181 = vector.shape_cast %180 : vector<8x8xf32> to vector<8x8x1xf32>
    %182 = vector.broadcast %181 : vector<8x8x1xf32> to vector<8x8x8xf32>
    %183 = arith.subf %179, %182 : vector<8x8x8xf32>
    %184 = math.exp %183 : vector<8x8x8xf32>
    %cst_42 = arith.constant dense<0.000000e+00> : vector<8x8xf32>
    %185 = vector.multi_reduction <add>, %184, %cst_42 [2] : vector<8x8x8xf32> to vector<8x8xf32>
    %186 = vector.shape_cast %185 : vector<8x8xf32> to vector<8x8x1xf32>
    %187 = vector.broadcast %186 : vector<8x8x1xf32> to vector<8x8x8xf32>
    %188 = arith.divf %184, %187 : vector<8x8x8xf32>
    "tpu.trace_start"() <{level = 10 : i32, message = "gqk,gkd->gqd"}> : () -> ()
    %cst_43 = arith.constant dense<0.000000e+00> : vector<8x8x8xf32>
    %189 = tpu.matmul %188, %178, %cst_43 {dimension_numbers = #tpu.dot_dimension_numbers<[2], [1], [1], [2], [0, 0, 0, 1, 1, 2], [0], [0]>} : vector<8x8x8xf32>, vector<8x8x8xf32>, vector<8x8x8xf32> -> vector<8x8x8xf32>
    "tpu.trace_stop"() : () -> ()
    %190 = vector.extract_strided_slice %189 {offsets = [0, 0, 0], sizes = [2, 8, 8], strides = [1, 1, 1]} : vector<8x8x8xf32> to vector<2x8x8xf32>
    %191 = vector.shape_cast %190 : vector<2x8x8xf32> to vector<16x8xf32>
    %192 = vector.extract_strided_slice %132 {offsets = [0, 0], sizes = [8, 32], strides = [1, 1]} : vector<32x32xf32> to vector<8x32xf32>
    %cst_44 = arith.constant dense<0.000000e+00> : vector<16x32xf32>
    %193 = tpu.matmul %191, %192, %cst_44 {dimension_numbers = #tpu.dot_dimension_numbers<[1], [0], [0], [1], [0, 0, 1, 1], [], []>} : vector<16x8xf32>, vector<8x32xf32>, vector<16x32xf32> -> vector<16x32xf32>
    %194 = vector.extract_strided_slice %189 {offsets = [2, 0, 0], sizes = [2, 8, 8], strides = [1, 1, 1]} : vector<8x8x8xf32> to vector<2x8x8xf32>
    %195 = vector.shape_cast %194 : vector<2x8x8xf32> to vector<16x8xf32>
    %196 = vector.extract_strided_slice %132 {offsets = [8, 0], sizes = [8, 32], strides = [1, 1]} : vector<32x32xf32> to vector<8x32xf32>
    %cst_45 = arith.constant dense<0.000000e+00> : vector<16x32xf32>
    %197 = tpu.matmul %195, %196, %cst_45 {dimension_numbers = #tpu.dot_dimension_numbers<[1], [0], [0], [1], [0, 0, 1, 1], [], []>} : vector<16x8xf32>, vector<8x32xf32>, vector<16x32xf32> -> vector<16x32xf32>
    %198 = arith.addf %193, %197 : vector<16x32xf32>
    %199 = vector.extract_strided_slice %189 {offsets = [4, 0, 0], sizes = [2, 8, 8], strides = [1, 1, 1]} : vector<8x8x8xf32> to vector<2x8x8xf32>
    %200 = vector.shape_cast %199 : vector<2x8x8xf32> to vector<16x8xf32>
    %201 = vector.extract_strided_slice %132 {offsets = [16, 0], sizes = [8, 32], strides = [1, 1]} : vector<32x32xf32> to vector<8x32xf32>
    %cst_46 = arith.constant dense<0.000000e+00> : vector<16x32xf32>
    %202 = tpu.matmul %200, %201, %cst_46 {dimension_numbers = #tpu.dot_dimension_numbers<[1], [0], [0], [1], [0, 0, 1, 1], [], []>} : vector<16x8xf32>, vector<8x32xf32>, vector<16x32xf32> -> vector<16x32xf32>
    %203 = arith.addf %198, %202 : vector<16x32xf32>
    %204 = vector.extract_strided_slice %189 {offsets = [6, 0, 0], sizes = [2, 8, 8], strides = [1, 1, 1]} : vector<8x8x8xf32> to vector<2x8x8xf32>
    %205 = vector.shape_cast %204 : vector<2x8x8xf32> to vector<16x8xf32>
    %206 = vector.extract_strided_slice %132 {offsets = [24, 0], sizes = [8, 32], strides = [1, 1]} : vector<32x32xf32> to vector<8x32xf32>
    %cst_47 = arith.constant dense<0.000000e+00> : vector<16x32xf32>
    %207 = tpu.matmul %205, %206, %cst_47 {dimension_numbers = #tpu.dot_dimension_numbers<[1], [0], [0], [1], [0, 0, 1, 1], [], []>} : vector<16x8xf32>, vector<8x32xf32>, vector<16x32xf32> -> vector<16x32xf32>
    %208 = arith.addf %203, %207 : vector<16x32xf32>
    %209 = vector.broadcast %138 : vector<1x32xf32> to vector<16x32xf32>
    %210 = arith.addf %208, %209 : vector<16x32xf32>
    %211 = arith.addf %121, %210 : vector<16x32xf32>
    %cst_48 = arith.constant dense<0.000000e+00> : vector<16xf32>
    %212 = vector.multi_reduction <add>, %211, %cst_48 [1] : vector<16x32xf32> to vector<16xf32>
    %213 = vector.shape_cast %212 : vector<16xf32> to vector<16x1xf32>
    %cst_49 = arith.constant 3.200000e+01 : f32
    %214 = vector.broadcast %cst_49 : f32 to vector<16x1xf32>
    %215 = arith.divf %213, %214 : vector<16x1xf32>
    %216 = vector.broadcast %215 : vector<16x1xf32> to vector<16x32xf32>
    %217 = arith.subf %211, %216 : vector<16x32xf32>
    %218 = arith.mulf %217, %217 : vector<16x32xf32>
    %cst_50 = arith.constant dense<0.000000e+00> : vector<16xf32>
    %219 = vector.multi_reduction <add>, %218, %cst_50 [1] : vector<16x32xf32> to vector<16xf32>
    %220 = vector.shape_cast %219 : vector<16xf32> to vector<16x1xf32>
    %cst_51 = arith.constant 3.200000e+01 : f32
    %221 = vector.broadcast %cst_51 : f32 to vector<16x1xf32>
    %222 = arith.divf %220, %221 : vector<16x1xf32>
    %223 = vector.broadcast %215 : vector<16x1xf32> to vector<16x32xf32>
    %224 = arith.subf %211, %223 : vector<16x32xf32>
    %cst_52 = arith.constant 9.99999974E-6 : f32
    %225 = vector.broadcast %cst_52 : f32 to vector<16x1xf32>
    %226 = arith.addf %222, %225 : vector<16x1xf32>
    %227 = math.rsqrt %226 : vector<16x1xf32>
    %228 = vector.broadcast %227 : vector<16x1xf32> to vector<16x32xf32>
    %229 = arith.mulf %224, %228 : vector<16x32xf32>
    %230 = vector.broadcast %136 : vector<1x32xf32> to vector<16x32xf32>
    %231 = arith.mulf %229, %230 : vector<16x32xf32>
    %232 = vector.broadcast %137 : vector<1x32xf32> to vector<16x32xf32>
    %233 = arith.addf %231, %232 : vector<16x32xf32>
    %cst_53 = arith.constant dense<0.000000e+00> : vector<16x128xf32>
    %234 = tpu.matmul %233, %133, %cst_53 {dimension_numbers = #tpu.dot_dimension_numbers<[1], [0], [0], [1], [0, 0, 1, 1], [], []>} : vector<16x32xf32>, vector<32x128xf32>, vector<16x128xf32> -> vector<16x128xf32>
    %235 = vector.broadcast %141 : vector<1x128xf32> to vector<16x128xf32>
    %236 = arith.addf %234, %235 : vector<16x128xf32>
    %cst_54 = arith.constant 0.000000e+00 : f32
    %237 = vector.broadcast %cst_54 : f32 to vector<16x128xf32>
    %238 = arith.maximumf %236, %237 : vector<16x128xf32>
    %cst_55 = arith.constant dense<0.000000e+00> : vector<16x32xf32>
    %239 = tpu.matmul %238, %127, %cst_55 {dimension_numbers = #tpu.dot_dimension_numbers<[1], [0], [0], [1], [0, 0, 1, 1], [], []>} : vector<16x128xf32>, vector<128x32xf32>, vector<16x32xf32> -> vector<16x32xf32>
    %240 = vector.broadcast %139 : vector<1x32xf32> to vector<16x32xf32>
    %241 = arith.addf %239, %240 : vector<16x32xf32>
    %242 = arith.addf %211, %241 : vector<16x32xf32>
    %c2_i32 = arith.constant 2 : i32
    %c0_56 = arith.constant 0 : index
    %c0_57 = arith.constant 0 : index
    %243 = vector.load %arg5[%c0_56, %c0_57] : memref<16x32xf32, #tpu.memory_space<vmem>>, vector<16x32xf32>
    tpu.vector_store %arg5[%c0_56, %c0_57], %242 {strides = array<i32>} : memref<16x32xf32, #tpu.memory_space<vmem>>, vector<16x32xf32>,
    return
  }
  func.func @transform_0(%arg0: i32) -> (i32, i32) {
    %c0_i32 = arith.constant 0 : i32
    %c0_i32_0 = arith.constant 0 : i32
    %c0_i32_1 = arith.constant 0 : i32
    return %c0_i32, %c0_i32_0 : i32, i32
  }
  func.func @transform_1(%arg0: i32) -> (i32, i32, i32) {
    %c0_i32 = arith.constant 0 : i32
    %c0_i32_0 = arith.constant 0 : i32
    %c0_i32_1 = arith.constant 0 : i32
    %c0_i32_2 = arith.constant 0 : i32
    return %c0_i32, %c0_i32_0, %c0_i32_1 : i32, i32, i32
  }
  func.func @transform_2(%arg0: i32) -> (i32, i32, i32) {
    %c0_i32 = arith.constant 0 : i32
    %c0_i32_0 = arith.constant 0 : i32
    %c0_i32_1 = arith.constant 0 : i32
    %c0_i32_2 = arith.constant 0 : i32
    return %c0_i32, %c0_i32_0, %c0_i32_1 : i32, i32, i32
  }
  func.func @transform_3(%arg0: i32) -> (i32, i32, i32) {
    %c0_i32 = arith.constant 0 : i32
    %c0_i32_0 = arith.constant 0 : i32
    %c0_i32_1 = arith.constant 0 : i32
    %c0_i32_2 = arith.constant 0 : i32
    return %c0_i32, %c0_i32_0, %c0_i32_1 : i32, i32, i32
  }
  func.func @transform_4(%arg0: i32) -> (i32, i32) {
    %c0_i32 = arith.constant 0 : i32
    %c0_i32_0 = arith.constant 0 : i32
    %c0_i32_1 = arith.constant 0 : i32
    return %c0_i32, %c0_i32_0 : i32, i32
  }
}

</mosaic_0001>

<bundles_post_ra>
// kernel: tpu_custom_call.1
= control target key start
LH: loop header
LB: loop body
LE: loop exit
PB: predicated region body
PF: predicated region fallthrough
CT: control target
= control target key end

     0   :  { %vm45_vm0 = vcmask 261120   ;;  %s5644_s0 = inlined_call_operand.vmem [shape: f32[16,32], index: 0, kind: input, shape index: {}]   ;;  %s5645_s1 = inlined_call_operand.vmem [shape: f32[2,32,256], index: 1, kind: input, shape index: {}]   ;;  %s5646_s2 = inlined_call_operand.vmem [shape: f32[2,128,32], index: 2, kind: input, shape index: {}]   ;;  %s5647_s3 = inlined_call_operand.vmem [shape: f32[2,8,128], index: 3, kind: input, shape index: {}]   ;;  %s5648_s4 = inlined_call_operand.hbm [shape: f32[16,32], index: 4, kind: output, shape index: {}]  }
   0x1   :  { %v4913_v0 = vld [vmem:[%s5644_s0] sm:$0xff]  ;;  %v4918_v1 = vld [vmem:[%s5644_s0 + $0x8] sm:$0xff] }
   0x2   :  { %9 = vsyncpa [#allocation3], 0  ;;  %v46_v2 = vsel %vm45_vm0, %v4913_v0, 0.0  ;;  %v49_v3 = vsel %vm45_vm0, %v4918_v1, 0.0  ;;  %v4931_v14 = vld [vmem:[%s5645_s1] sm:$0xff]  ;;  %v4936_v15 = vld [vmem:[%s5645_s1 + $0x10] sm:$0xff]  ;;  %v73_v22 = vlaneseq }
   0x3   :  { %47 = vadd.xlane.f32.xlu0 %v46_v2  ;;  %v4941_v16 = vld [vmem:[%s5645_s1 + $0x20] sm:$0xff]  ;;  %v4651_v17 = vpack.c.bf16 %v4936_v15, %v4931_v14  ;;  %v4948_v18 = vld [vmem:[%s5645_s1 + $0x30] sm:$0xff]  ;;  %v4874_v43 = vmov 0.0   ;;  %vm4875_vm1 = vmmov 0   ;;  %s4876_s28 = smov 104   ;;  %s4877_s29 = smov 80  }
   0x4   :  { %v4655_v19 = vpack.c.bf16 %v4948_v18, %v4941_v16  ;;  %v4952_v26 = vshrl.u32 %v73_v22, 7  ;;  %v4958_v29 = vld [vmem:[%s5647_s3] sm:$0xff]  ;;  %4353 = vmatprep.subr.mxu1 %v4874_v43  ;;  %4355 = vmatprep.mubr.msk.f32.mxu1 %vm4875_vm1, %v4874_v43  ;;  %s4878_s30 = smov 56   ;;  %s4879_s5 = smov 120   ;;  %vm186_vm2 = vcmask 64512  }
   0x5   :  { %4652 = vmatprep.subr.bf16.mxu0 %v4651_v17  ;;  %s4880_s6 = smov 112   ;;  %s4881_s7 = smov 32  }
   0x6   :  { %4654 = vmatpush3.bf16.msra.mxu0 %v4651_v17  ;;  %v75_v28 = vsub.s32 0, %v4952_v26  ;;  %v81_v30 = vsub.s32 1, %v4952_v26  ;;  %v87_v41 = vsub.s32 6, %v4952_v26 }
   0x7   :  { %50 = vadd.xlane.f32.xlu0 %v49_v3  ;;  %4656 = vmatprep.subr.bf16.mxu0 %v4655_v19 }
   0x8   :  { %v76_v31 = vrot.slane %v4958_v29, %v75_v28  ;;  %v82_v34 = vrot.slane %v4958_v29, %v81_v30  ;;  %v88_v42 = vrot.slane %v4958_v29, %v87_v41 }
   0xa   :  { %4658 = vmatpush3.bf16.msra.mxu0 %v4655_v19 }
   0xb   :  { %4348 = vmatprep.subr.mxu0 %v4874_v43 }
  0x90   :  { %v48_v4 = vpop.xlane.xlu0 %47 }
  0x91   :  { %v53_v5 = vmul.f32 0.03125, %v48_v4 }
  0x93   :  { %v55_v6 = vsub.f32 %v4913_v0, %v53_v5 }
  0x94   :  { %v51_v7 = vpop.xlane.xlu0 %50 }
  0x95   :  { %v54_v8 = vmul.f32 0.03125, %v51_v7  ;;  %v57_v9 = vmul.f32 %v55_v6, %v55_v6 }
  0x97   :  { %v56_v10 = vsub.f32 %v4918_v1, %v54_v8  ;;  %v59_v11 = vsel %vm45_vm0, %v57_v9, 0.0 }
  0x98   :  { %60 = vadd.xlane.f32.xlu1 %v59_v11 }
  0x99   :  { %v58_v12 = vmul.f32 %v56_v10, %v56_v10 }
  0x9b   :  { %v62_v13 = vsel %vm45_vm0, %v58_v12, 0.0 }
  0x9c   :  { %63 = vadd.xlane.f32.xlu1 %v62_v13 }
 0x125   :  { %v61_v20 = vpop.xlane.xlu1 %60 }
 0x126   :  { %v65_v21 = vmul.f32 0.03125, %v61_v20 }
 0x128   :  { %v67_v23 = vadd.f32 1e-05, %v65_v21 }
 0x129   :  { %v64_v24 = vpop.xlane.xlu1 %63 }
 0x12a   :  { %4770 = vrsqrt.f32 %v67_v23  ;;  %v66_v25 = vmul.f32 0.03125, %v64_v24 }
 0x12c   :  { %v68_v27 = vadd.f32 1e-05, %v66_v25 }
 0x12e   :  { %4772 = vrsqrt.f32 %v68_v27 }
 0x134   :  { %v4771_v32 = vpop.eup %4770 }
 0x135   :  { %v71_v33 = vmul.f32 %v4771_v32, %v55_v6 }
 0x137   :  { %v77_v35 = vmul.f32 %v76_v31, %v71_v33 }
 0x138   :  { %v4773_v36 = vpop.eup %4772 }
 0x139   :  { %v72_v37 = vmul.f32 %v4773_v36, %v56_v10  ;;  %v83_v38 = vadd.f32 %v82_v34, %v77_v35 }
 0x13b   :  { %v78_v39 = vmul.f32 %v76_v31, %v72_v37  ;;  %4345 = vmatprep.mubr.msk.f32.mxu0 %vm45_vm0, %v83_v38 }
 0x13d   :  { %v84_v40 = vadd.f32 %v82_v34, %v78_v39 }
 0x13f   :  { %4346 = vmatmul.mubr.msk.f32.vlgmr.msra.gmra.mrb[0].mxu0 %vm45_vm0, %v84_v40 }
 0x140   :  { %4350 = vmatprep.mubr.msk.f32.mxu0 %vm4875_vm1, %v4874_v43 }
 0x212   :  { %v4347_v44 = vpop.f32.mrb[0].mxu0 }
 0x213   :  { %v4979_v45 = vadd.f32 %v4347_v44, %v88_v42  ;;  %v161_v46 = vpop.f32.mrb[1].mxu0 }
 0x214   :  { %v4981_v47 = vadd.f32 %v161_v46, %v88_v42 }
 0x215   :  { %174 = vrot.lane.b32.xlu1 %v4979_v45, %s4876_s28 }
 0x216   :  { %172 = vrot.lane.b32.xlu0 %v4981_v47, %s4876_s28 }
 0x219   :  { %176 = vrot.lane.b32.xlu1 %v4981_v47, %s4877_s29 }
 0x21a   :  { %180 = vrot.lane.b32.xlu0 %v4981_v47, %s4878_s30 }
 0x21d   :  { %178 = vrot.lane.b32.xlu1 %v4979_v45, %s4877_s29 }
 0x21e   :  { %184 = vrot.lane.b32.xlu0 %v4981_v47, %s4879_s5 }
 0x221   :  { %182 = vrot.lane.b32.xlu1 %v4979_v45, %s4878_s30 }
 0x225   :  { %261 = vrot.lane.b32.xlu1 %v4979_v45, %s4879_s5 }
 0x287   :  { %v4999_v48 = vpop.permute.xlu1 %174 }
 0x288   :  { %413 = vrot.lane.b32.xlu1 %v4999_v48, %s4879_s5  ;;  %v5003_v49 = vpop.permute.xlu0 %172 }
 0x289   :  { %337 = vrot.lane.b32.xlu0 %v5003_v49, %s4879_s5 }
 0x28b   :  { %v5007_v50 = vpop.permute.xlu1 %176 }
 0x28c   :  { %v5009_v51 = vpop.permute.xlu0 %180 }
 0x28d   :  { %489 = vrot.lane.b32.xlu0 %v5007_v50, %s4879_s5 }
 0x28f   :  { %v5013_v52 = vpop.permute.xlu1 %178 }
 0x290   :  { %565 = vrot.lane.b32.xlu1 %v5013_v52, %s4879_s5  ;;  %v185_v53 = vpop.permute.xlu0 %184 }
 0x291   :  { %641 = vrot.lane.b32.xlu0 %v5009_v51, %s4879_s5  ;;  %4349 = vmatpush3.xpose.msk.msra.mxu0 %vm186_vm2, %v185_v53 }
 0x292   :  { %4358 = vmatprep.subr.mxu0 %v4874_v43 }
 0x293   :  { %v5021_v54 = vpop.permute.xlu1 %182 }
 0x294   :  { %717 = vrot.lane.b32.xlu1 %v5021_v54, %s4879_s5  ;;  %4351 = vmatmul.mubr.msk.f32.vlgmr.msra.gmra.mrb[2].mxu0 %vm186_vm2, %v4981_v47 }
 0x295   :  { %4360 = vmatprep.mubr.msk.f32.mxu0 %vm4875_vm1, %v4874_v43 }
 0x297   :  { %v262_v55 = vpop.permute.xlu1 %261 }
 0x298   :  { %4354 = vmatpush3.xpose.msk.msra.mxu1 %vm186_vm2, %v262_v55 }
 0x299   :  { %4363 = vmatprep.subr.mxu1 %v4874_v43 }
 0x29b   :  { %4356 = vmatmul.mubr.msk.f32.vlgmr.msra.gmra.mrb[0].mxu1 %vm186_vm2, %v4979_v45 }
 0x29c   :  { %4365 = vmatprep.mubr.msk.f32.mxu1 %vm4875_vm1, %v4874_v43 }
 0x2fa   :  { %v414_v56 = vpop.permute.xlu1 %413 }
 0x2fb   :  { %4364 = vmatpush3.xpose.msk.msra.mxu1 %vm186_vm2, %v414_v56  ;;  %v338_v57 = vpop.permute.xlu0 %337 }
 0x2fc   :  { %4359 = vmatpush3.xpose.msk.msra.mxu0 %vm186_vm2, %v338_v57  ;;  %4373 = vmatprep.subr.mxu1 %v4874_v43 }
 0x2fd   :  { %4368 = vmatprep.subr.mxu0 %v4874_v43 }
 0x2fe   :  { %4366 = vmatmul.mubr.msk.f32.vlgmr.msra.gmra.mrb[2].mxu1 %vm186_vm2, %v4999_v48 }
 0x2ff   :  { %4361 = vmatmul.mubr.msk.f32.vlgmr.msra.gmra.mrb[4].mxu0 %vm186_vm2, %v5003_v49  ;;  %v490_v58 = vpop.permute.xlu0 %489  ;;  %4375 = vmatprep.mubr.msk.f32.mxu1 %vm4875_vm1, %v4874_v43 }
 0x300   :  { %4369 = vmatpush3.xpose.msk.msra.mxu0 %vm186_vm2, %v490_v58  ;;  %4370 = vmatprep.mubr.msk.f32.mxu0 %vm4875_vm1, %v4874_v43 }
 0x301   :  { %4378 = vmatprep.subr.mxu0 %v4874_v43 }
 0x302   :  { %v566_v59 = vpop.permute.xlu1 %565 }
 0x303   :  { %4371 = vmatmul.mubr.msk.f32.vlgmr.msra.gmra.mrb[6].mxu0 %vm186_vm2, %v5007_v50  ;;  %4374 = vmatpush3.xpose.msk.msra.mxu1 %vm186_vm2, %v566_v59  ;;  %v642_v60 = vpop.permute.xlu0 %641 }
 0x304   :  { %4379 = vmatpush3.xpose.msk.msra.mxu0 %vm186_vm2, %v642_v60  ;;  %4383 = vmatprep.subr.mxu1 %v4874_v43 }
 0x305   :  { %4380 = vmatprep.mubr.msk.f32.mxu0 %vm4875_vm1, %v4874_v43  ;;  %4388 = vmatprep.subr.mxu0 %v4874_v43 }
 0x306   :  { %4376 = vmatmul.mubr.msk.f32.vlgmr.msra.gmra.mrb[4].mxu1 %vm186_vm2, %v5013_v52  ;;  %v718_v61 = vpop.permute.xlu1 %717 }
 0x307   :  { %4381 = vmatmul.mubr.msk.f32.vlgmr.msra.gmra.mrb[8].mxu0 %vm186_vm2, %v5009_v51  ;;  %4384 = vmatpush3.xpose.msk.msra.mxu1 %vm186_vm2, %v718_v61 }
 0x308   :  { %4385 = vmatprep.mubr.msk.f32.mxu1 %vm4875_vm1, %v4874_v43  ;;  %4393 = vmatprep.subr.mxu1 %v4874_v43 }
 0x309   :  { %4390 = vmatprep.mubr.msk.f32.mxu0 %vm4875_vm1, %v4874_v43 }
 0x30a   :  { %4386 = vmatmul.mubr.msk.f32.vlgmr.msra.gmra.mrb[6].mxu1 %vm186_vm2, %v5021_v54 }
 0x30b   :  { %4395 = vmatprep.mubr.msk.f32.mxu1 %vm4875_vm1, %v4874_v43 }
 0x367   :  { %v257_v62 = vpop.f32.mrb[2].mxu0 }
 0x368   :  { %v4352_v63 = vpop.f32.mrb[3].mxu0  ;;  %v793_v2 = vsel %vm186_vm2, %v257_v62, -inf }
 0x369   :  { %794 = vmax.xlane.f32.xlu0 %v793_v2 }
 0x36e   :  { %v333_v3 = vpop.f32.mrb[0].mxu1 }
 0x36f   :  { %v4357_v4 = vpop.f32.mrb[1].mxu1  ;;  %v796_v5 = vsel %vm186_vm2, %v333_v3, -inf }
 0x370   :  { %797 = vmax.xlane.f32.xlu1 %v796_v5 }
 0x3d1   :  { %v485_v6 = vpop.f32.mrb[2].mxu1 }
 0x3d2   :  { %v409_v7 = vpop.f32.mrb[4].mxu0  ;;  %v4367_v8 = vpop.f32.mrb[3].mxu1  ;;  %v802_v9 = vsel %vm186_vm2, %v485_v6, -inf }
 0x3d3   :  { %803 = vmax.xlane.f32.xlu0 %v802_v9  ;;  %v4362_v10 = vpop.f32.mrb[5].mxu0  ;;  %v799_v12 = vsel %vm186_vm2, %v409_v7, -inf }
 0x3d6   :  { %v5074_v11 = vpop.f32.mrb[6].mxu0 }
 0x3d7   :  { %800 = vmax.xlane.f32.xlu0 %v799_v12  ;;  %v4372_v13 = vpop.f32.mrb[7].mxu0  ;;  %v805_v22 = vsel %vm186_vm2, %v5074_v11, -inf }
 0x3d9   :  { %v5077_v17 = vpop.f32.mrb[4].mxu1 }
 0x3da   :  { %v4377_v19 = vpop.f32.mrb[5].mxu1  ;;  %v5079_v20 = vpop.f32.mrb[8].mxu0  ;;  %v808_v21 = vsel %vm186_vm2, %v5077_v17, -inf }
 0x3db   :  { %809 = vmax.xlane.f32.xlu1 %v808_v21  ;;  %806 = vmax.xlane.f32.xlu0 %v805_v22  ;;  %v4382_v23 = vpop.f32.mrb[9].mxu0  ;;  %v811_v31 = vsel %vm186_vm2, %v5079_v20, -inf }
 0x3dd   :  { %v789_v24 = vpop.f32.mrb[6].mxu1 }
 0x3de   :  { %v4387_v25 = vpop.f32.mrb[7].mxu1  ;;  %v814_v27 = vsel %vm186_vm2, %v789_v24, -inf }
 0x3df   :  { %815 = vmax.xlane.f32.xlu1 %v814_v27  ;;  %812 = vmax.xlane.f32.xlu0 %v811_v31 }
 0x3f0   :  { %957 = vrot.lane.b32.xlu1 %v4979_v45, %s4880_s6 }
 0x3f5   :  { %881 = vrot.lane.b32.xlu0 %v4981_v47, %s4880_s6 }
 0x3f6   :  { %v795_v32 = vpop.xlane.xlu0 %794 }
 0x3f7   :  { %v817_v33 = vsub.f32 %v257_v62, %v795_v32 }
 0x3f9   :  { %v825_v36 = vmul.f32 1.442695, %v817_v33 }
 0x3fb   :  { %4774 = vpow2.f32 %v825_v36 }
 0x3fd   :  { %v798_v34 = vpop.xlane.xlu1 %797 }
 0x3fe   :  { %v818_v35 = vsub.f32 %v333_v3, %v798_v34 }
 0x400   :  { %v827_v37 = vmul.f32 1.442695, %v818_v35 }
 0x402   :  { %4776 = vpow2.f32 %v827_v37 }
 0x405   :  { %v4775_v38 = vpop.eup %4774 }
 0x406   :  { %v841_v42 = vsel %vm186_vm2, %v4775_v38, 0.0 }
 0x40c   :  { %v4777_v39 = vpop.eup %4776 }
 0x40d   :  { %v844_v40 = vsel %vm186_vm2, %v4777_v39, 0.0 }
 0x414   :  { %845 = vadd.xlane.f32.xlu1 %v844_v40  ;;  %842 = vadd.xlane.f32.xlu0 %v841_v42 }
 0x460   :  { %v804_v44 = vpop.xlane.xlu0 %803 }
 0x461   :  { %v820_v45 = vsub.f32 %v485_v6, %v804_v44 }
 0x463   :  { %v831_v46 = vmul.f32 1.442695, %v820_v45 }
 0x464   :  { %v801_v47 = vpop.xlane.xlu0 %800 }
 0x465   :  { %4778 = vpow2.f32 %v831_v46  ;;  %v819_v53 = vsub.f32 %v409_v7, %v801_v47 }
 0x467   :  { %v829_v55 = vmul.f32 1.442695, %v819_v53 }
 0x468   :  { %v810_v56 = vpop.xlane.xlu1 %809  ;;  %v807_v57 = vpop.xlane.xlu0 %806 }
 0x469   :  { %4780 = vpow2.f32 %v829_v55  ;;  %v821_v4 = vsub.f32 %v5074_v11, %v807_v57  ;;  %v822_v5 = vsub.f32 %v5077_v17, %v810_v56 }
 0x46b   :  { %v833_v6 = vmul.f32 1.442695, %v821_v4  ;;  %v835_v8 = vmul.f32 1.442695, %v822_v5 }
 0x46c   :  { %v816_v58 = vpop.xlane.xlu1 %815  ;;  %v813_v59 = vpop.xlane.xlu0 %812 }
 0x46d   :  { %v824_v7 = vsub.f32 %v789_v24, %v816_v58  ;;  %4782 = vpow2.f32 %v833_v6 }
 0x46e   :  { %4784 = vpow2.f32 %v835_v8 }
 0x46f   :  { %v5094_v60 = vpop.eup %4778  ;;  %v839_v9 = vmul.f32 1.442695, %v824_v7 }
 0x470   :  { %v958_v61 = vpop.permute.xlu1 %957  ;;  %v882_v62 = vpop.permute.xlu0 %881  ;;  %v850_v63 = vsel %vm186_vm2, %v5094_v60, 0.0 }
 0x471   :  { %4394 = vmatpush3.msra.mxu1 %v958_v61  ;;  %851 = vadd.xlane.f32.xlu1 %v850_v63  ;;  %4786 = vpow2.f32 %v839_v9 }
 0x472   :  { %4389 = vmatpush3.msra.mxu0 %v882_v62  ;;  %4403 = vmatprep.subr.mxu1 %v4874_v43 }
 0x473   :  { %v5099_v2 = vpop.eup %4780  ;;  %4398 = vmatprep.subr.mxu0 %v4874_v43 }
 0x474   :  { %v847_v3 = vsel %vm186_vm2, %v5099_v2, 0.0 }
 0x475   :  { %848 = vadd.xlane.f32.xlu0 %v847_v3 }
 0x482   :  { %1109 = vrot.lane.b32.xlu1 %v4999_v48, %s4880_s6  ;;  %v823_v48 = vsub.f32 %v5079_v20, %v813_v59 }
 0x486   :  { %1185 = vrot.lane.b32.xlu1 %v5007_v50, %s4880_s6  ;;  %v837_v50 = vmul.f32 1.442695, %v823_v48 }
 0x48a   :  { %1261 = vrot.lane.b32.xlu1 %v5013_v52, %s4880_s6 }
 0x48b   :  { %1033 = vrot.lane.b32.xlu0 %v5003_v49, %s4880_s6  ;;  %v4783_v49 = vpop.eup %4782 }
 0x48c   :  { %v5115_v52 = vpop.eup %4784  ;;  %v853_v11 = vsel %vm186_vm2, %v4783_v49, 0.0 }
 0x48d   :  { %v5118_v13 = vpop.eup %4786  ;;  %v856_v20 = vsel %vm186_vm2, %v5115_v52, 0.0 }
 0x48e   :  { %v862_v22 = vsel %vm186_vm2, %v5118_v13, 0.0 }
 0x4a1   :  { %v846_v10 = vpop.xlane.xlu1 %845  ;;  %v843_v12 = vpop.xlane.xlu0 %842 }
 0x4a2   :  { %4788 = vrcp.f32 %v846_v10 }
 0x4a3   :  { %4790 = vrcp.f32 %v843_v12 }
 0x4a4   :  { %4792 = vpow2.f32 %v837_v50 }
 0x4aa   :  { %854 = vadd.xlane.f32.xlu0 %v853_v11 }
 0x4ac   :  { %v4789_v17 = vpop.eup %4788 }
 0x4ad   :  { %v4791_v19 = vpop.eup %4790  ;;  %v868_v21 = vmul.f32 %v4789_v17, %v4777_v39 }
 0x4ae   :  { %v5124_v23 = vpop.eup %4792  ;;  %v866_v24 = vmul.f32 %v4791_v19, %v4775_v38  ;;  %857 = vadd.xlane.f32.xlu1 %v856_v20  ;;  %863 = vadd.xlane.f32.xlu0 %v862_v22 }
 0x4af   :  { %4396 = vmatmul.mubr.msk.f32.vlgmr.msra.gmra.mrb[8].mxu1 %vm186_vm2, %v868_v21  ;;  %v859_v25 = vsel %vm186_vm2, %v5124_v23, 0.0 }
 0x4b0   :  { %4391 = vmatmul.mubr.msk.f32.vlgmr.msra.gmra.mrb[10].mxu0 %vm186_vm2, %v866_v24  ;;  %4405 = vmatprep.mubr.msk.f32.mxu1 %vm4875_vm1, %v4874_v43 }
 0x4b1   :  { %4400 = vmatprep.mubr.msk.f32.mxu0 %vm4875_vm1, %v4874_v43 }
 0x4b2   :  { %860 = vadd.xlane.f32.xlu1 %v859_v25 }
 0x4c3   :  { %1413 = vrot.lane.b32.xlu1 %v5021_v54, %s4880_s6 }
 0x4c4   :  { %1337 = vrot.lane.b32.xlu0 %v5009_v51, %s4880_s6 }
 0x4c7   :  { %1575 = vrot.lane.b32.xlu1 %v4931_v14, %s4881_s7 }
 0x4c8   :  { %1490 = vrot.lane.b32.xlu0 %v4936_v15, %s4881_s7 }
 0x4cb   :  { %1747 = vrot.lane.b32.xlu1 %v4948_v18, %s4881_s7 }
 0x4cc   :  { %1660 = vrot.lane.b32.xlu0 %v4941_v16, %s4881_s7 }
 0x4fe   :  { %v852_v27 = vpop.xlane.xlu1 %851 }
 0x4ff   :  { %4794 = vrcp.f32 %v852_v27 }
 0x502   :  { %v1110_v31 = vpop.permute.xlu1 %1109  ;;  %v849_v54 = vpop.xlane.xlu0 %848 }
 0x503   :  { %4796 = vrcp.f32 %v849_v54  ;;  %4404 = vmatpush3.msra.mxu1 %v1110_v31 }
 0x504   :  { %4413 = vmatprep.subr.mxu1 %v4874_v43 }
 0x506   :  { %v1186_v51 = vpop.permute.xlu1 %1185  ;;  %v1034_v32 = vpop.permute.xlu0 %1033 }
 0x507   :  { %4399 = vmatpush3.msra.mxu0 %v1034_v32 }
 0x508   :  { %4408 = vmatprep.subr.mxu0 %v4874_v43 }
 0x509   :  { %v4795_v14 = vpop.eup %4794 }
 0x50a   :  { %v872_v15 = vmul.f32 %v4795_v14, %v5094_v60  ;;  %v1262_v16 = vpop.permute.xlu1 %1261 }
 0x50c   :  { %4406 = vmatmul.mubr.msk.f32.vlgmr.msra.gmra.mrb[10].mxu1 %vm186_vm2, %v872_v15  ;;  %v21_v15 = vld [vmem:[%s5645_s1 + $0x8] sm:$0xff] }
 0x50d   :  { %v4797_v18 = vpop.eup %4796  ;;  %4414 = vmatpush3.msra.mxu1 %v1262_v16  ;;  %4415 = vmatprep.mubr.msk.f32.mxu1 %vm4875_vm1, %v4874_v43  ;;  %v23_v16 = vld [vmem:[%s5645_s1 + $0x18] sm:$0xff] }
 0x50e   :  { %v870_v33 = vmul.f32 %v4797_v18, %v5099_v2  ;;  %4423 = vmatprep.subr.mxu1 %v4874_v43  ;;  %v4659_v18 = vpack.c.bf16 %v23_v16, %v21_v15  ;;  %v1968_v16 = vsub.s32 5, %v4952_v26 }
 0x510   :  { %4401 = vmatmul.mubr.msk.f32.vlgmr.msra.gmra.mrb[12].mxu0 %vm186_vm2, %v870_v33  ;;  %v25_v33 = vld [vmem:[%s5645_s1 + $0x28] sm:$0xff] }
 0x511   :  { %4409 = vmatpush3.msra.mxu0 %v1186_v51  ;;  %4410 = vmatprep.mubr.msk.f32.mxu0 %vm4875_vm1, %v4874_v43 }
 0x512   :  { %4418 = vmatprep.subr.mxu0 %v4874_v43 }
 0x537   :  { %v855_v34 = vpop.xlane.xlu0 %854 }
 0x538   :  { %4798 = vrcp.f32 %v855_v34  ;;  %v27_v34 = vld [vmem:[%s5645_s1 + $0x38] sm:$0xff] }
 0x53b   :  { %v858_v35 = vpop.xlane.xlu1 %857  ;;  %v864_v36 = vpop.xlane.xlu0 %863 }
 0x53c   :  { %4800 = vrcp.f32 %v858_v35  ;;  %v4663_v35 = vpack.c.bf16 %v27_v34, %v25_v33 }
 0x53d   :  { %4802 = vrcp.f32 %v864_v36  ;;  %v28_v36 = vld [vmem:[%s5646_s2] sm:$0xff] }
 0x53f   :  { %v861_v37 = vpop.xlane.xlu1 %860  ;;  %v1338_v40 = vpop.permute.xlu0 %1337 }
 0x540   :  { %4804 = vrcp.f32 %v861_v37  ;;  %v29_v37 = vld [vmem:[%s5646_s2 + $0x8] sm:$0xff] }
 0x542   :  { %v4799_v38 = vpop.eup %4798 }
 0x543   :  { %v874_v39 = vmul.f32 %v4799_v38, %v4783_v49  ;;  %v1414_v46 = vpop.permute.xlu1 %1413  ;;  %v1491_v56 = vpop.permute.xlu0 %1490  ;;  %v1835_v49 = vsub.s32 4, %v4952_v26  ;;  %v30_v38 = vld [vmem:[%s5646_s2 + $0x10] sm:$0xff] }
 0x545   :  { %4411 = vmatmul.mubr.msk.f32.vlgmr.msra.gmra.mrb[14].mxu0 %vm186_vm2, %v874_v39  ;;  %v4667_v39 = vpack.c.bf16 %v29_v37, %v28_v36 }
 0x546   :  { %v4801_v42 = vpop.eup %4800  ;;  %4419 = vmatpush3.msra.mxu0 %v1338_v40  ;;  %4420 = vmatprep.mubr.msk.f32.mxu0 %vm4875_vm1, %v4874_v43  ;;  %v31_v40 = vld [vmem:[%s5646_s2 + $0x18] sm:$0xff] }
 0x547   :  { %v876_v44 = vmul.f32 %v4801_v42, %v5115_v52  ;;  %v4803_v45 = vpop.eup %4802  ;;  %4428 = vmatprep.subr.mxu0 %v1491_v56  ;;  %v1576_v57 = vpop.permute.xlu1 %1575  ;;  %v1836_v52 = vrot.slane %v4958_v29, %v1835_v49  ;;  %v4671_v42 = vpack.c.bf16 %v31_v40, %v30_v38 }
 0x548   :  { %v880_v53 = vmul.f32 %v4803_v45, %v5118_v13  ;;  %v1661_v4 = vpop.permute.xlu0 %1660  ;;  %v33_v45 = vld [vmem:[%s5646_s2 + $0x28] sm:$0xff] }
 0x549   :  { %4416 = vmatmul.mubr.msk.f32.vlgmr.msra.gmra.mrb[12].mxu1 %vm186_vm2, %v876_v44  ;;  %v32_v44 = vld [vmem:[%s5646_s2 + $0x20] sm:$0xff] }
 0x54a   :  { %v4805_v47 = vpop.eup %4804  ;;  %4424 = vmatpush3.msra.mxu1 %v1414_v46  ;;  %4425 = vmatprep.mubr.msk.f32.mxu1 %vm4875_vm1, %v4874_v43  ;;  %v4675_v46 = vpack.c.bf16 %v33_v45, %v32_v44 }
 0x54b   :  { %v878_v55 = vmul.f32 %v4805_v47, %v5124_v23  ;;  %v1748_v5 = vpop.permute.xlu1 %1747  ;;  %4668 = vmatprep.subr.bf16.mxu1 %v4667_v39  ;;  %v34_v47 = vld [vmem:[%s5646_s2 + $0x30] sm:$0xff] }
 0x54d   :  { %4421 = vmatmul.mubr.msk.f32.vlgmr.msra.gmra.mrb[16].mxu0 %vm186_vm2, %v878_v55  ;;  %4426 = vmatmul.mubr.msk.f32.vlgmr.msra.gmra.mrb[14].mxu1 %vm186_vm2, %v880_v53  ;;  %v35_v53 = vld [vmem:[%s5646_s2 + $0x38] sm:$0xff] }
 0x54e   :  { %4429 = vmatpush3.msra.mxu0 %v1491_v56  ;;  %4670 = vmatpush3.bf16.msra.mxu1 %v4667_v39  ;;  %v4679_v55 = vpack.c.bf16 %v35_v53, %v34_v47  ;;  %v36_v56 = vld [vmem:[%s5646_s2 + $0x40] sm:$0xff] }
 0x54f   :  { %4433 = vmatprep.subr.mxu0 %v1576_v57  ;;  %4672 = vmatprep.subr.bf16.mxu1 %v4671_v42 }
 0x552   :  { %4674 = vmatpush3.bf16.msra.mxu1 %v4671_v42 }
 0x553   :  { %4676 = vmatprep.subr.bf16.mxu1 %v4675_v46 }
 0x556   :  { %4678 = vmatpush3.bf16.msra.mxu1 %v4675_v46 }
 0x557   :  { %4680 = vmatprep.subr.bf16.mxu1 %v4679_v55 }
 0x55a   :  { %4682 = vmatpush3.bf16.msra.mxu1 %v4679_v55 }
 0x582   :  { %v1029_v58 = vpop.f32.mrb[8].mxu1 }
 0x583   :  { %v953_v59 = vpop.f32.mrb[10].mxu0  ;;  %v4397_v60 = vpop.f32.mrb[9].mxu1 }
 0x584   :  { %v4392_v61 = vpop.f32.mrb[11].mxu0  ;;  %v39_v60 = vld [vmem:[%s5646_s2 + $0x58] sm:$0xff] }
 0x5df   :  { %v1181_v62 = vpop.f32.mrb[10].mxu1 }
 0x5e0   :  { %v4407_v63 = vpop.f32.mrb[11].mxu1 }
 0x5e1   :  { %v41_v63 = vld [vmem:[%s5646_s2 + $0x68] sm:$0xff] }
 0x5e3   :  { %v1105_v2 = vpop.f32.mrb[12].mxu0 }
 0x5e4   :  { %v4402_v3 = vpop.f32.mrb[13].mxu0  ;;  %4430 = vmatprep.mubr.msk.f32.mxu0 %vm186_vm2, %v1105_v2 }
 0x5e5   :  { %4431 = vmatmul.mubr.msk.f32.vlgmr.msra.gmra.mrb[18].mxu0 %vm186_vm2, %v1181_v62  ;;  %v40_v62 = vld [vmem:[%s5646_s2 + $0x60] sm:$0xff] }
 0x5e6   :  { %4435 = vmatprep.mubr.msk.f32.mxu0 %vm186_vm2, %v953_v59  ;;  %4434 = vmatpush3.msra.mxu0 %v1576_v57  ;;  %v37_v57 = vld [vmem:[%s5646_s2 + $0x48] sm:$0xff]  ;;  %v38_v59 = vld [vmem:[%s5646_s2 + $0x50] sm:$0xff]  ;;  %v4691_v2 = vpack.c.bf16 %v41_v63, %v40_v62 }
 0x5e7   :  { %4438 = vmatprep.subr.mxu0 %v1661_v4  ;;  %v4687_v61 = vpack.c.bf16 %v39_v60, %v38_v59  ;;  %v5315_v59 = vld [vmem:[%s5645_s1 + $0x60] sm:$0xff]  ;;  %v5320_v60 = vld [vmem:[%s5645_s1 + $0x70] sm:$0xff] }
 0x5ed   :  { %4436 = vmatmul.mubr.msk.f32.vlgmr.msra.gmra.mrb[18].mxu0 %vm186_vm2, %v1029_v58  ;;  %v4683_v58 = vpack.c.bf16 %v37_v57, %v36_v56  ;;  %v5303_v56 = vld [vmem:[%s5645_s1 + $0x40] sm:$0xff]  ;;  %v5308_v57 = vld [vmem:[%s5645_s1 + $0x50] sm:$0xff] }
 0x5ee   :  { %4439 = vmatpush3.msra.mxu0 %v1661_v4 }
 0x5ef   :  { %4443 = vmatprep.subr.mxu0 %v1748_v5  ;;  %4684 = vmatprep.subr.bf16.mxu1 %v4683_v58 }
 0x5f0   :  { %4686 = vmatpush3.bf16.msra.mxu1 %v4683_v58  ;;  %v4699_v58 = vpack.c.bf16 %v5308_v57, %v5303_v56 }
 0x5f1   :  { %4688 = vmatprep.subr.bf16.mxu1 %v4687_v61 }
 0x5f4   :  { %4690 = vmatpush3.bf16.msra.mxu1 %v4687_v61  ;;  %v4703_v61 = vpack.c.bf16 %v5320_v60, %v5315_v59 }
 0x5f5   :  { %4692 = vmatprep.subr.bf16.mxu1 %v4691_v2 }
 0x5f8   :  { %4694 = vmatpush3.bf16.msra.mxu1 %v4691_v2 }
 0x618   :  { %v1257_v6 = vpop.f32.mrb[14].mxu0 }
 0x619   :  { %v4412_v7 = vpop.f32.mrb[15].mxu0  ;;  %4440 = vmatprep.mubr.msk.f32.mxu0 %vm186_vm2, %v1257_v6 }
 0x61c   :  { %v1333_v8 = vpop.f32.mrb[12].mxu1 }
 0x61d   :  { %v4417_v9 = vpop.f32.mrb[13].mxu1  ;;  %4441 = vmatmul.mubr.msk.f32.vlgmr.msra.gmra.mrb[18].mxu0 %vm186_vm2, %v1333_v8 }
 0x61e   :  { %4444 = vmatpush3.msra.mxu0 %v1748_v5  ;;  %v1869_v9 = vsub.s32 2, %v4952_v26 }
 0x61f   :  { %4660 = vmatprep.subr.bf16.mxu0 %v4659_v18 }
 0x620   :  { %v1409_v48 = vpop.f32.mrb[16].mxu0  ;;  %v1485_v50 = vpop.f32.mrb[14].mxu1 }
 0x621   :  { %v4422_v10 = vpop.f32.mrb[17].mxu0  ;;  %v4427_v12 = vpop.f32.mrb[15].mxu1  ;;  %4445 = vmatprep.mubr.msk.f32.mxu0 %vm186_vm2, %v1409_v48  ;;  %v1875_v48 = vsub.s32 3, %v4952_v26 }
 0x625   :  { %4446 = vmatmul.mubr.msk.f32.vlgmr.msra.gmra.mrb[18].mxu0 %vm186_vm2, %v1485_v50  ;;  %v1870_v50 = vrot.slane %v4958_v29, %v1869_v9 }
 0x626   :  { %4662 = vmatpush3.bf16.msra.mxu0 %v4659_v18  ;;  %v1969_v18 = vrot.slane %v4958_v29, %v1968_v16 }
 0x627   :  { %4664 = vmatprep.subr.bf16.mxu0 %v4663_v35 }
 0x62a   :  { %4666 = vmatpush3.bf16.msra.mxu0 %v4663_v35 }
 0x62b   :  { %4700 = vmatprep.subr.bf16.mxu0 %v4699_v58 }
 0x6f8   :  { %v4447_v11 = vpop.f32.mrb[18].mxu0 }
 0x6f9   :  { %v1838_v13 = vadd.f32 %v4447_v11, %v1836_v52  ;;  %v1822_v17 = vpop.f32.mrb[19].mxu0 }
 0x6fa   :  { %v1837_v19 = vadd.f32 %v1836_v52, %v1822_v17  ;;  %v1876_v52 = vrot.slane %v4958_v29, %v1875_v48 }
 0x6fb   :  { %v5182_v21 = vadd.f32 %v1838_v13, %v4918_v1 }
 0x6fc   :  { %v5185_v20 = vadd.f32 %v1837_v19, %v4913_v0 }
 0x6fd   :  { %v1844_v22 = vsel %vm45_vm0, %v5182_v21, 0.0 }
 0x6fe   :  { %1845 = vadd.xlane.f32.xlu1 %v1844_v22  ;;  %v1841_v23 = vsel %vm45_vm0, %v5185_v20, 0.0 }
 0x6ff   :  { %1842 = vadd.xlane.f32.xlu0 %v1841_v23 }
 0x78b   :  { %v1846_v24 = vpop.xlane.xlu1 %1845 }
 0x78c   :  { %v1848_v25 = vmul.f32 0.03125, %v1846_v24  ;;  %v1843_v27 = vpop.xlane.xlu0 %1842  ;;  %v42_v24 = vld [vmem:[%s5646_s2 + $0x70] sm:$0xff] }
 0x78d   :  { %v1847_v31 = vmul.f32 0.03125, %v1843_v27 }
 0x78e   :  { %v5192_v54 = vsub.f32 %v5182_v21, %v1848_v25  ;;  %v43_v25 = vld [vmem:[%s5646_s2 + $0x78] sm:$0xff] }
 0x78f   :  { %v5195_v1 = vsub.f32 %v5185_v20, %v1847_v31  ;;  %v4695_v27 = vpack.c.bf16 %v43_v25, %v42_v24  ;;  %v1881_v31 = vsub.s32 7, %v4952_v26 }
 0x790   :  { %v1852_v32 = vmul.f32 %v5192_v54, %v5192_v54 }
 0x791   :  { %v1851_v0 = vmul.f32 %v5195_v1, %v5195_v1  ;;  %4696 = vmatprep.subr.bf16.mxu1 %v4695_v27 }
 0x792   :  { %v1856_v14 = vsel %vm45_vm0, %v1852_v32, 0.0  ;;  %4698 = vmatpush3.bf16.msra.mxu1 %v4695_v27 }
 0x793   :  { %v1853_v51 = vsel %vm45_vm0, %v1851_v0, 0.0  ;;  %4530 = vmatprep.subr.mxu1 %v4874_v43 }
 0x794   :  { %1854 = vadd.xlane.f32.xlu0 %v1853_v51 }
 0x798   :  { %1857 = vadd.xlane.f32.xlu0 %v1856_v14 }
 0x821   :  { %v1855_v3 = vpop.xlane.xlu0 %1854 }
 0x822   :  { %v1859_v4 = vmul.f32 0.03125, %v1855_v3 }
 0x824   :  { %v1861_v5 = vadd.f32 1e-05, %v1859_v4 }
 0x825   :  { %v1858_v6 = vpop.xlane.xlu0 %1857 }
 0x826   :  { %4806 = vrsqrt.f32 %v1861_v5  ;;  %v1860_v7 = vmul.f32 0.03125, %v1858_v6  ;;  %v5328_v6 = vld [vmem:[%s5647_s3 + $0x8] sm:$0xff] }
 0x828   :  { %v1862_v8 = vadd.f32 1e-05, %v1860_v7  ;;  %v2104_v7 = vrot.slane %v5328_v6, %v75_v28  ;;  %v2116_v28 = vrot.slane %v5328_v6, %v87_v41 }
 0x82a   :  { %4808 = vrsqrt.f32 %v1862_v8 }
 0x830   :  { %v4807_v10 = vpop.eup %4806 }
 0x831   :  { %v1865_v12 = vmul.f32 %v4807_v10, %v5195_v1  ;;  %v2110_v10 = vrot.slane %v5328_v6, %v81_v30 }
 0x833   :  { %v1871_v11 = vmul.f32 %v1870_v50, %v1865_v12 }
 0x834   :  { %v4809_v13 = vpop.eup %4808 }
 0x835   :  { %v1866_v17 = vmul.f32 %v4809_v13, %v5192_v54  ;;  %v1877_v19 = vadd.f32 %v1876_v52, %v1871_v11  ;;  %v1882_v54 = vrot.slane %v4958_v29, %v1881_v31 }
 0x837   :  { %v1872_v22 = vmul.f32 %v1870_v50, %v1866_v17  ;;  %4456 = vmatprep.mubr.msk.f32.mxu0 %vm45_vm0, %v1877_v19 }
 0x839   :  { %v1878_v23 = vadd.f32 %v1876_v52, %v1872_v22 }
 0x83b   :  { %4457 = vmatmul.mubr.msk.f32.vlgmr.msra.gmra.mrb[20].mxu0 %vm45_vm0, %v1878_v23 }
 0x83c   :  { %4702 = vmatpush3.bf16.msra.mxu0 %v4699_v58 }
 0x83d   :  { %4704 = vmatprep.subr.bf16.mxu0 %v4703_v61 }
 0x840   :  { %4706 = vmatpush3.bf16.msra.mxu0 %v4703_v61 }
 0x841   :  { %4505 = vmatprep.subr.mxu0 %v4874_v43 }
 0x90e   :  { %v4458_v1 = vpop.f32.mrb[20].mxu0 }
 0x90f   :  { %v1961_v0 = vadd.f32 %v4458_v1, %v1882_v54  ;;  %v1955_v51 = vpop.f32.mrb[21].mxu0 }
 0x910   :  { %v1956_v32 = vadd.f32 %v1955_v51, %v1882_v54 }
 0x911   :  { %v1965_v15 = vmax.f32 %v1961_v0, 0.0 }
 0x912   :  { %v1964_v14 = vmax.f32 %v1956_v32, 0.0 }
 0x914   :  { %4491 = vmatprep.mubr.f32.mxu1 %v1964_v14 }
 0x915   :  { %4492 = vmatmul.mubr.f32.vlgmr.msra.gmra.mrb[16].mxu1 %v1965_v15 }
 0x916   :  { %4532 = vmatprep.mubr.msk.f32.mxu1 %vm4875_vm1, %v4874_v43 }
 0x9e8   :  { %v4493_v33 = vpop.f32.mrb[16].mxu1 }
 0x9e9   :  { %v2042_v34 = vadd.f32 %v4493_v33, %v1969_v18  ;;  %v2036_v35 = vpop.f32.mrb[17].mxu1 }
 0x9ea   :  { %v2037_v36 = vadd.f32 %v2036_v35, %v1969_v18 }
 0x9eb   :  { %v5287_v37 = vadd.f32 %v2042_v34, %v5182_v21 }
 0x9ec   :  { %v5290_v38 = vadd.f32 %v2037_v36, %v5185_v20 }
 0x9ed   :  { %v2078_v39 = vsel %vm45_vm0, %v5287_v37, 0.0 }
 0x9ee   :  { %2079 = vadd.xlane.f32.xlu1 %v2078_v39  ;;  %v2075_v40 = vsel %vm45_vm0, %v5290_v38, 0.0 }
 0x9ef   :  { %2076 = vadd.xlane.f32.xlu0 %v2075_v40 }
 0xa7b   :  { %v2080_v42 = vpop.xlane.xlu1 %2079 }
 0xa7c   :  { %v2082_v29 = vmul.f32 0.03125, %v2080_v42  ;;  %v2077_v44 = vpop.xlane.xlu0 %2076 }
 0xa7d   :  { %v2081_v45 = vmul.f32 0.03125, %v2077_v44 }
 0xa7e   :  { %v2084_v46 = vsub.f32 %v5287_v37, %v2082_v29 }
 0xa7f   :  { %v2083_v21 = vsub.f32 %v5290_v38, %v2081_v45 }
 0xa80   :  { %v2086_v47 = vmul.f32 %v2084_v46, %v2084_v46 }
 0xa81   :  { %v2085_v53 = vmul.f32 %v2083_v21, %v2083_v21 }
 0xa82   :  { %v2090_v20 = vsel %vm45_vm0, %v2086_v47, 0.0 }
 0xa83   :  { %2091 = vadd.xlane.f32.xlu1 %v2090_v20  ;;  %v2087_v55 = vsel %vm45_vm0, %v2085_v53, 0.0 }
 0xa84   :  { %2088 = vadd.xlane.f32.xlu0 %v2087_v55 }
 0xb10   :  { %v2092_v62 = vpop.xlane.xlu1 %2091 }
 0xb11   :  { %v2094_v63 = vmul.f32 0.03125, %v2092_v62  ;;  %v2089_v2 = vpop.xlane.xlu0 %2088 }
 0xb12   :  { %v2093_v3 = vmul.f32 0.03125, %v2089_v2 }
 0xb13   :  { %v2096_v4 = vadd.f32 1e-05, %v2094_v63 }
 0xb14   :  { %v2095_v5 = vadd.f32 1e-05, %v2093_v3 }
 0xb15   :  { %4810 = vrsqrt.f32 %v2096_v4 }
 0xb16   :  { %4812 = vrsqrt.f32 %v2095_v5 }
 0xb1f   :  { %v4811_v8 = vpop.eup %4810 }
 0xb20   :  { %v4813_v50 = vpop.eup %4812  ;;  %v2100_v12 = vmul.f32 %v4811_v8, %v2084_v46 }
 0xb21   :  { %v2099_v52 = vmul.f32 %v4813_v50, %v2083_v21 }
 0xb22   :  { %v2106_v11 = vmul.f32 %v2104_v7, %v2100_v12 }
 0xb23   :  { %v2105_v13 = vmul.f32 %v2104_v7, %v2099_v52 }
 0xb24   :  { %v2112_v17 = vadd.f32 %v2110_v10, %v2106_v11 }
 0xb25   :  { %v2111_v19 = vadd.f32 %v2110_v10, %v2105_v13 }
 0xb27   :  { %4502 = vmatprep.mubr.msk.f32.mxu0 %vm45_vm0, %v2111_v19 }
 0xb28   :  { %4503 = vmatmul.mubr.msk.f32.vlgmr.msra.gmra.mrb[22].mxu0 %vm45_vm0, %v2112_v17 }
 0xb29   :  { %4507 = vmatprep.mubr.msk.f32.mxu0 %vm4875_vm1, %v4874_v43 }
 0xbfb   :  { %v4504_v22 = vpop.f32.mrb[22].mxu0 }
 0xbfc   :  { %v5343_v23 = vadd.f32 %v4504_v22, %v2116_v28  ;;  %v2189_v30 = vpop.f32.mrb[23].mxu0 }
 0xbfd   :  { %v5345_v24 = vadd.f32 %v2189_v30, %v2116_v28 }
 0xbfe   :  { %2202 = vrot.lane.b32.xlu1 %v5343_v23, %s4876_s28 }
 0xbff   :  { %2200 = vrot.lane.b32.xlu0 %v5345_v24, %s4876_s28 }
 0xc02   :  { %2204 = vrot.lane.b32.xlu1 %v5345_v24, %s4877_s29 }
 0xc03   :  { %2208 = vrot.lane.b32.xlu0 %v5345_v24, %s4878_s30 }
 0xc06   :  { %2206 = vrot.lane.b32.xlu1 %v5343_v23, %s4877_s29 }
 0xc07   :  { %2212 = vrot.lane.b32.xlu0 %v5345_v24, %s4879_s5 }
 0xc0a   :  { %2210 = vrot.lane.b32.xlu1 %v5343_v23, %s4878_s30 }
 0xc0e   :  { %2288 = vrot.lane.b32.xlu1 %v5343_v23, %s4879_s5 }
 0xc70   :  { %v5363_v41 = vpop.permute.xlu1 %2202 }
 0xc71   :  { %2440 = vrot.lane.b32.xlu1 %v5363_v41, %s4879_s5  ;;  %v5367_v25 = vpop.permute.xlu0 %2200 }
 0xc72   :  { %2364 = vrot.lane.b32.xlu0 %v5367_v25, %s4879_s5 }
 0xc74   :  { %v5371_v27 = vpop.permute.xlu1 %2204 }
 0xc75   :  { %v5373_v54 = vpop.permute.xlu0 %2208 }
 0xc76   :  { %2516 = vrot.lane.b32.xlu0 %v5371_v27, %s4879_s5 }
 0xc78   :  { %v5377_v1 = vpop.permute.xlu1 %2206 }
 0xc79   :  { %2592 = vrot.lane.b32.xlu1 %v5377_v1, %s4879_s5  ;;  %v2213_v0 = vpop.permute.xlu0 %2212 }
 0xc7a   :  { %2668 = vrot.lane.b32.xlu0 %v5373_v54, %s4879_s5  ;;  %4506 = vmatpush3.xpose.msk.msra.mxu0 %vm186_vm2, %v2213_v0 }
 0xc7b   :  { %4510 = vmatprep.subr.mxu0 %v4874_v43 }
 0xc7c   :  { %v5385_v51 = vpop.permute.xlu1 %2210 }
 0xc7d   :  { %2744 = vrot.lane.b32.xlu1 %v5385_v51, %s4879_s5  ;;  %4508 = vmatmul.mubr.msk.f32.vlgmr.msra.gmra.mrb[24].mxu0 %vm186_vm2, %v5345_v24 }
 0xc7e   :  { %4512 = vmatprep.mubr.msk.f32.mxu0 %vm4875_vm1, %v4874_v43 }
 0xc80   :  { %v2289_v32 = vpop.permute.xlu1 %2288 }
 0xc81   :  { %4511 = vmatpush3.xpose.msk.msra.mxu0 %vm186_vm2, %v2289_v32 }
 0xc82   :  { %4515 = vmatprep.subr.mxu0 %v4874_v43 }
 0xc84   :  { %4513 = vmatmul.mubr.msk.f32.vlgmr.msra.gmra.mrb[26].mxu0 %vm186_vm2, %v5343_v23 }
 0xc85   :  { %4517 = vmatprep.mubr.msk.f32.mxu0 %vm4875_vm1, %v4874_v43 }
 0xce3   :  { %v2441_v15 = vpop.permute.xlu1 %2440 }
 0xce4   :  { %v2365_v14 = vpop.permute.xlu0 %2364 }
 0xce5   :  { %4516 = vmatpush3.xpose.msk.msra.mxu0 %vm186_vm2, %v2365_v14 }
 0xce6   :  { %4520 = vmatprep.subr.mxu0 %v4874_v43 }
 0xce8   :  { %4518 = vmatmul.mubr.msk.f32.vlgmr.msra.gmra.mrb[28].mxu0 %vm186_vm2, %v5367_v25  ;;  %v2517_v18 = vpop.permute.xlu0 %2516 }
 0xce9   :  { %4521 = vmatpush3.xpose.msk.msra.mxu0 %vm186_vm2, %v2441_v15  ;;  %4522 = vmatprep.mubr.msk.f32.mxu0 %vm4875_vm1, %v4874_v43 }
 0xcea   :  { %4525 = vmatprep.subr.mxu0 %v4874_v43 }
 0xceb   :  { %v2593_v33 = vpop.permute.xlu1 %2592 }
 0xcec   :  { %4523 = vmatmul.mubr.msk.f32.vlgmr.msra.gmra.mrb[30].mxu0 %vm186_vm2, %v5363_v41  ;;  %4531 = vmatpush3.xpose.msk.msra.mxu1 %vm186_vm2, %v2593_v33  ;;  %v2669_v35 = vpop.permute.xlu0 %2668 }
 0xced   :  { %4526 = vmatpush3.xpose.msk.msra.mxu0 %vm186_vm2, %v2517_v18  ;;  %4540 = vmatprep.subr.mxu1 %v4874_v43 }
 0xcee   :  { %4527 = vmatprep.mubr.msk.f32.mxu0 %vm4875_vm1, %v4874_v43  ;;  %4535 = vmatprep.subr.mxu0 %v4874_v43 }
 0xcef   :  { %4533 = vmatmul.mubr.msk.f32.vlgmr.msra.gmra.mrb[18].mxu1 %vm186_vm2, %v5377_v1  ;;  %v2745_v34 = vpop.permute.xlu1 %2744 }
 0xcf0   :  { %4528 = vmatmul.mubr.msk.f32.vlgmr.msra.gmra.mrb[32].mxu0 %vm186_vm2, %v5371_v27  ;;  %4541 = vmatpush3.xpose.msk.msra.mxu1 %vm186_vm2, %v2745_v34 }
 0xcf1   :  { %4536 = vmatpush3.xpose.msk.msra.mxu0 %vm186_vm2, %v2669_v35  ;;  %4542 = vmatprep.mubr.msk.f32.mxu1 %vm4875_vm1, %v4874_v43 }
 0xcf2   :  { %4537 = vmatprep.mubr.msk.f32.mxu0 %vm4875_vm1, %v4874_v43  ;;  %4550 = vmatprep.subr.mxu1 %v4874_v43 }
 0xcf3   :  { %4543 = vmatmul.mubr.msk.f32.vlgmr.msra.gmra.mrb[20].mxu1 %vm186_vm2, %v5385_v51  ;;  %4545 = vmatprep.subr.mxu0 %v4874_v43 }
 0xcf4   :  { %4538 = vmatmul.mubr.msk.f32.vlgmr.msra.gmra.mrb[34].mxu0 %vm186_vm2, %v5373_v54  ;;  %4552 = vmatprep.mubr.msk.f32.mxu1 %vm4875_vm1, %v4874_v43 }
 0xcf5   :  { %4547 = vmatprep.mubr.msk.f32.mxu0 %vm4875_vm1, %v4874_v43 }
 0xd50   :  { %v2284_v36 = vpop.f32.mrb[24].mxu0 }
 0xd51   :  { %v4509_v39 = vpop.f32.mrb[25].mxu0  ;;  %v2820_v40 = vsel %vm186_vm2, %v2284_v36, -inf }
 0xd52   :  { %2821 = vmax.xlane.f32.xlu0 %v2820_v40 }
 0xd57   :  { %v2360_v42 = vpop.f32.mrb[26].mxu0 }
 0xd58   :  { %v4514_v29 = vpop.f32.mrb[27].mxu0  ;;  %v2823_v44 = vsel %vm186_vm2, %v2360_v42, -inf }
 0xd59   :  { %2824 = vmax.xlane.f32.xlu1 %v2823_v44 }
 0xdbb   :  { %v2436_v45 = vpop.f32.mrb[28].mxu0 }
 0xdbc   :  { %v4519_v46 = vpop.f32.mrb[29].mxu0  ;;  %v2826_v21 = vsel %vm186_vm2, %v2436_v45, -inf }
 0xdbd   :  { %2827 = vmax.xlane.f32.xlu0 %v2826_v21 }
 0xdbf   :  { %v2512_v47 = vpop.f32.mrb[30].mxu0 }
 0xdc0   :  { %v4524_v53 = vpop.f32.mrb[31].mxu0  ;;  %v2829_v20 = vsel %vm186_vm2, %v2512_v47, -inf }
 0xdc1   :  { %2830 = vmax.xlane.f32.xlu0 %v2829_v20 }
 0xdc2   :  { %v2664_v55 = vpop.f32.mrb[18].mxu1 }
 0xdc3   :  { %v2588_v58 = vpop.f32.mrb[32].mxu0  ;;  %v4534_v61 = vpop.f32.mrb[19].mxu1  ;;  %v2835_v62 = vsel %vm186_vm2, %v2664_v55, -inf }
 0xdc4   :  { %2836 = vmax.xlane.f32.xlu1 %v2835_v62  ;;  %v4529_v63 = vpop.f32.mrb[33].mxu0  ;;  %v2832_v2 = vsel %vm186_vm2, %v2588_v58, -inf }
 0xdc5   :  { %2833 = vmax.xlane.f32.xlu0 %v2832_v2 }
 0xdc6   :  { %v2816_v3 = vpop.f32.mrb[20].mxu1 }
 0xdc7   :  { %v5441_v4 = vpop.f32.mrb[34].mxu0  ;;  %v4544_v5 = vpop.f32.mrb[21].mxu1  ;;  %v2841_v7 = vsel %vm186_vm2, %v2816_v3, -inf }
 0xdc8   :  { %2842 = vmax.xlane.f32.xlu1 %v2841_v7  ;;  %v4539_v8 = vpop.f32.mrb[35].mxu0  ;;  %v2838_v50 = vsel %vm186_vm2, %v5441_v4, -inf }
 0xdc9   :  { %2839 = vmax.xlane.f32.xlu0 %v2838_v50 }
 0xdd9   :  { %2984 = vrot.lane.b32.xlu1 %v5343_v23, %s4880_s6 }
 0xddf   :  { %2908 = vrot.lane.b32.xlu0 %v5345_v24, %s4880_s6  ;;  %v2822_v10 = vpop.xlane.xlu0 %2821 }
 0xde0   :  { %v2844_v11 = vsub.f32 %v2284_v36, %v2822_v10 }
 0xde2   :  { %v2852_v17 = vmul.f32 1.442695, %v2844_v11 }
 0xde6   :  { %v2825_v12 = vpop.xlane.xlu1 %2824 }
 0xde7   :  { %v2845_v52 = vsub.f32 %v2360_v42, %v2825_v12 }
 0xde9   :  { %v2854_v13 = vmul.f32 1.442695, %v2845_v52 }
 0xdeb   :  { %4814 = vpow2.f32 %v2854_v13 }
 0xdec   :  { %4816 = vpow2.f32 %v2852_v17 }
 0xdf5   :  { %v5450_v19 = vpop.eup %4814 }
 0xdf6   :  { %v5452_v28 = vpop.eup %4816  ;;  %v2871_v22 = vsel %vm186_vm2, %v5450_v19, 0.0 }
 0xdf7   :  { %v2868_v23 = vsel %vm186_vm2, %v5452_v28, 0.0 }
 0xdfd   :  { %2872 = vadd.xlane.f32.xlu1 %v2871_v22 }
 0xdfe   :  { %2869 = vadd.xlane.f32.xlu0 %v2868_v23 }
 0xe4a   :  { %v2828_v30 = vpop.xlane.xlu0 %2827 }
 0xe4b   :  { %v2846_v24 = vsub.f32 %v2436_v45, %v2828_v30 }
 0xe4d   :  { %v2856_v0 = vmul.f32 1.442695, %v2846_v24 }
 0xe4e   :  { %v2831_v32 = vpop.xlane.xlu0 %2830 }
 0xe4f   :  { %4818 = vpow2.f32 %v2856_v0  ;;  %v2847_v14 = vsub.f32 %v2512_v47, %v2831_v32 }
 0xe51   :  { %v2837_v15 = vpop.xlane.xlu1 %2836  ;;  %v2858_v34 = vmul.f32 1.442695, %v2847_v14 }
 0xe52   :  { %v2849_v18 = vsub.f32 %v2664_v55, %v2837_v15  ;;  %v2834_v33 = vpop.xlane.xlu0 %2833 }
 0xe53   :  { %v2848_v36 = vsub.f32 %v2588_v58, %v2834_v33 }
 0xe54   :  { %v2862_v35 = vmul.f32 1.442695, %v2849_v18 }
 0xe55   :  { %v2843_v39 = vpop.xlane.xlu1 %2842  ;;  %v2860_v29 = vmul.f32 1.442695, %v2848_v36 }
 0xe56   :  { %4820 = vpow2.f32 %v2862_v35  ;;  %v2851_v40 = vsub.f32 %v2816_v3, %v2843_v39  ;;  %v2840_v42 = vpop.xlane.xlu0 %2839 }
 0xe57   :  { %4822 = vpow2.f32 %v2858_v34 }
 0xe58   :  { %v2866_v44 = vmul.f32 1.442695, %v2851_v40 }
 0xe59   :  { %v5458_v46 = vpop.eup %4818  ;;  %v2985_v45 = vpop.permute.xlu1 %2984 }
 0xe5a   :  { %4824 = vpow2.f32 %v2866_v44  ;;  %4551 = vmatpush3.msra.mxu1 %v2985_v45  ;;  %v2909_v21 = vpop.permute.xlu0 %2908  ;;  %v2874_v47 = vsel %vm186_vm2, %v5458_v46, 0.0 }
 0xe5b   :  { %2875 = vadd.xlane.f32.xlu0 %v2874_v47  ;;  %4546 = vmatpush3.msra.mxu0 %v2909_v21  ;;  %4826 = vpow2.f32 %v2860_v29 }
 0xe5c   :  { %4560 = vmatprep.subr.mxu1 %v4874_v43  ;;  %4555 = vmatprep.subr.mxu0 %v4874_v43 }
 0xe60   :  { %v5464_v53 = vpop.eup %4820 }
 0xe61   :  { %v2883_v20 = vsel %vm186_vm2, %v5464_v53, 0.0  ;;  %v4823_v55 = vpop.eup %4822 }
 0xe62   :  { %2884 = vadd.xlane.f32.xlu1 %v2883_v20  ;;  %v2877_v62 = vsel %vm186_vm2, %v4823_v55, 0.0 }
 0xe64   :  { %v5468_v58 = vpop.eup %4824 }
 0xe65   :  { %v2889_v61 = vsel %vm186_vm2, %v5468_v58, 0.0  ;;  %v5473_v63 = vpop.eup %4826 }
 0xe66   :  { %2890 = vadd.xlane.f32.xlu0 %v2889_v61  ;;  %2878 = vadd.xlane.f32.xlu1 %v2877_v62  ;;  %v2880_v2 = vsel %vm186_vm2, %v5473_v63, 0.0 }
 0xe6a   :  { %2881 = vadd.xlane.f32.xlu0 %v2880_v2  ;;  %v3863_v2 = vrot.slane %v5328_v6, %v1835_v49 }
 0xe77   :  { %3136 = vrot.lane.b32.xlu1 %v5363_v41, %s4880_s6  ;;  %v2850_v41 = vsub.f32 %v5441_v4, %v2840_v42 }
 0xe7b   :  { %3212 = vrot.lane.b32.xlu1 %v5371_v27, %s4880_s6  ;;  %v2864_v27 = vmul.f32 1.442695, %v2850_v41 }
 0xe7f   :  { %3288 = vrot.lane.b32.xlu1 %v5377_v1, %s4880_s6 }
 0xe80   :  { %3060 = vrot.lane.b32.xlu0 %v5367_v25, %s4880_s6 }
 0xe84   :  { %3364 = vrot.lane.b32.xlu0 %v5373_v54, %s4880_s6 }
 0xe88   :  { %3517 = vrot.lane.b32.xlu0 %v5308_v57, %s4881_s7 }
 0xe8a   :  { %v2873_v3 = vpop.xlane.xlu1 %2872 }
 0xe8b   :  { %4828 = vrcp.f32 %v2873_v3  ;;  %v2870_v5 = vpop.xlane.xlu0 %2869 }
 0xe8c   :  { %4830 = vrcp.f32 %v2870_v5  ;;  %3687 = vrot.lane.b32.xlu0 %v5315_v59, %s4881_s7 }
 0xe8d   :  { %4832 = vpow2.f32 %v2864_v27 }
 0xe95   :  { %v4829_v1 = vpop.eup %4828 }
 0xe96   :  { %v4831_v7 = vpop.eup %4830  ;;  %v2895_v25 = vmul.f32 %v4829_v1, %v5450_v19 }
 0xe97   :  { %v2893_v54 = vmul.f32 %v4831_v7, %v5452_v28  ;;  %v4833_v57 = vpop.eup %4832 }
 0xe98   :  { %4553 = vmatmul.mubr.msk.f32.vlgmr.msra.gmra.mrb[22].mxu1 %vm186_vm2, %v2895_v25  ;;  %v2886_v59 = vsel %vm186_vm2, %v4833_v57, 0.0 }
 0xe99   :  { %4548 = vmatmul.mubr.msk.f32.vlgmr.msra.gmra.mrb[36].mxu0 %vm186_vm2, %v2893_v54  ;;  %4562 = vmatprep.mubr.msk.f32.mxu1 %vm4875_vm1, %v4874_v43 }
 0xe9a   :  { %4557 = vmatprep.mubr.msk.f32.mxu0 %vm4875_vm1, %v4874_v43 }
 0xea3   :  { %2887 = vadd.xlane.f32.xlu1 %v2886_v59 }
 0xeb4   :  { %3440 = vrot.lane.b32.xlu1 %v5385_v51, %s4880_s6 }
 0xeb8   :  { %3602 = vrot.lane.b32.xlu1 %v5303_v56, %s4881_s7 }
 0xebc   :  { %3774 = vrot.lane.b32.xlu1 %v5320_v60, %s4881_s7 }
 0xee8   :  { %v2876_v4 = vpop.xlane.xlu0 %2875 }
 0xee9   :  { %4834 = vrcp.f32 %v2876_v4 }
 0xeef   :  { %v2885_v8 = vpop.xlane.xlu1 %2884 }
 0xef3   :  { %v2879_v50 = vpop.xlane.xlu1 %2878  ;;  %v2891_v10 = vpop.xlane.xlu0 %2890 }
 0xef4   :  { %4836 = vrcp.f32 %v2879_v50  ;;  %v4835_v11 = vpop.eup %4834 }
 0xef5   :  { %4838 = vrcp.f32 %v2885_v8  ;;  %v2897_v51 = vmul.f32 %v4835_v11, %v5458_v46  ;;  %v4131_v11 = vld [vmem:[%s5645_s1 + $0x58] sm:$0xff] }
 0xef7   :  { %v3137_v12 = vpop.permute.xlu1 %3136  ;;  %v2882_v52 = vpop.xlane.xlu0 %2881 }
 0xef8   :  { %4840 = vrcp.f32 %v2882_v52  ;;  %4561 = vmatpush3.msra.mxu1 %v3137_v12  ;;  %v4129_v52 = vld [vmem:[%s5645_s1 + $0x48] sm:$0xff] }
 0xef9   :  { %4570 = vmatprep.subr.mxu1 %v4874_v43  ;;  %4842 = vrcp.f32 %v2891_v10 }
 0xefb   :  { %v3213_v56 = vpop.permute.xlu1 %3212  ;;  %v3061_v13 = vpop.permute.xlu0 %3060 }
 0xefc   :  { %4556 = vmatpush3.msra.mxu0 %v3061_v13  ;;  %v4135_v13 = vld [vmem:[%s5645_s1 + $0x78] sm:$0xff] }
 0xefd   :  { %4558 = vmatmul.mubr.msk.f32.vlgmr.msra.gmra.mrb[38].mxu0 %vm186_vm2, %v2897_v51  ;;  %4565 = vmatprep.subr.mxu0 %v4874_v43  ;;  %v4707_v51 = vpack.c.bf16 %v4131_v11, %v4129_v52 }
 0xefe   :  { %v4837_v60 = vpop.eup %4836  ;;  %4566 = vmatpush3.msra.mxu0 %v3213_v56  ;;  %4567 = vmatprep.mubr.msk.f32.mxu0 %vm4875_vm1, %v4874_v43  ;;  %v4133_v56 = vld [vmem:[%s5645_s1 + $0x68] sm:$0xff] }
 0xeff   :  { %v2899_v17 = vmul.f32 %v4837_v60, %v4823_v55  ;;  %v3289_v19 = vpop.permute.xlu1 %3288  ;;  %4575 = vmatprep.subr.mxu0 %v4874_v43  ;;  %v4839_v28 = vpop.eup %4838  ;;  %v4711_v60 = vpack.c.bf16 %v4135_v13, %v4133_v56 }
 0xf00   :  { %v2903_v23 = vmul.f32 %v4839_v28, %v5464_v53  ;;  %v3365_v24 = vpop.permute.xlu0 %3364 }
 0xf01   :  { %4563 = vmatmul.mubr.msk.f32.vlgmr.msra.gmra.mrb[24].mxu1 %vm186_vm2, %v2899_v17  ;;  %v4136_v17 = vld [vmem:[%s5646_s2 + $0x80] sm:$0xff] }
 0xf02   :  { %v4841_v22 = vpop.eup %4840  ;;  %4571 = vmatpush3.msra.mxu1 %v3289_v19  ;;  %4572 = vmatprep.mubr.msk.f32.mxu1 %vm4875_vm1, %v4874_v43  ;;  %v4137_v19 = vld [vmem:[%s5646_s2 + $0x88] sm:$0xff] }
 0xf03   :  { %v2901_v30 = vmul.f32 %v4841_v22, %v5473_v63  ;;  %4580 = vmatprep.subr.mxu1 %v4874_v43  ;;  %v4843_v32 = vpop.eup %4842  ;;  %v4715_v28 = vpack.c.bf16 %v4137_v19, %v4136_v17 }
 0xf04   :  { %v2907_v14 = vmul.f32 %v4843_v32, %v5468_v58  ;;  %v3518_v34 = vpop.permute.xlu0 %3517 }
 0xf05   :  { %4568 = vmatmul.mubr.msk.f32.vlgmr.msra.gmra.mrb[40].mxu0 %vm186_vm2, %v2901_v30  ;;  %4573 = vmatmul.mubr.msk.f32.vlgmr.msra.gmra.mrb[26].mxu1 %vm186_vm2, %v2903_v23 }
 0xf06   :  { %4576 = vmatpush3.msra.mxu0 %v3365_v24  ;;  %4582 = vmatprep.mubr.msk.f32.mxu1 %vm4875_vm1, %v4874_v43 }
 0xf07   :  { %4577 = vmatprep.mubr.msk.f32.mxu0 %vm4875_vm1, %v4874_v43  ;;  %4585 = vmatprep.subr.mxu0 %v3518_v34 }
 0xf08   :  { %v3688_v46 = vpop.permute.xlu0 %3687 }
 0xf30   :  { %v2888_v0 = vpop.xlane.xlu1 %2887 }
 0xf31   :  { %4844 = vrcp.f32 %v2888_v0 }
 0xf34   :  { %v3441_v15 = vpop.permute.xlu1 %3440 }
 0xf35   :  { %4581 = vmatpush3.msra.mxu1 %v3441_v15 }
 0xf36   :  { %4583 = vmatmul.mubr.msk.f32.vlgmr.msra.gmra.mrb[28].mxu1 %vm186_vm2, %v2907_v14  ;;  %4708 = vmatprep.subr.bf16.mxu1 %v4707_v51  ;;  %v3897_v14 = vrot.slane %v5328_v6, %v1869_v9 }
 0xf37   :  { %4710 = vmatpush3.bf16.msra.mxu1 %v4707_v51 }
 0xf38   :  { %v3603_v35 = vpop.permute.xlu1 %3602  ;;  %4712 = vmatprep.subr.bf16.mxu1 %v4711_v60 }
 0xf3b   :  { %v4845_v18 = vpop.eup %4844  ;;  %4714 = vmatpush3.bf16.msra.mxu1 %v4711_v60 }
 0xf3c   :  { %v2905_v33 = vmul.f32 %v4845_v18, %v4833_v57  ;;  %v3775_v55 = vpop.permute.xlu1 %3774  ;;  %4716 = vmatprep.subr.bf16.mxu1 %v4715_v28 }
 0xf3e   :  { %4578 = vmatmul.mubr.msk.f32.vlgmr.msra.gmra.mrb[42].mxu0 %vm186_vm2, %v2905_v33  ;;  %v3903_v33 = vrot.slane %v5328_v6, %v1875_v48  ;;  %v4140_v48 = vld [vmem:[%s5646_s2 + $0xa0] sm:$0xff] }
 0xf3f   :  { %4586 = vmatpush3.msra.mxu0 %v3518_v34 }
 0xf40   :  { %4590 = vmatprep.subr.mxu0 %v3603_v35 }
 0xf6b   :  { %v3056_v43 = vpop.f32.mrb[22].mxu1 }
 0xf6c   :  { %v2980_v36 = vpop.f32.mrb[36].mxu0  ;;  %v4554_v39 = vpop.f32.mrb[23].mxu1 }
 0xf6d   :  { %v4549_v40 = vpop.f32.mrb[37].mxu0  ;;  %v4138_v39 = vld [vmem:[%s5646_s2 + $0x90] sm:$0xff] }
 0xf6e   :  { %v4139_v40 = vld [vmem:[%s5646_s2 + $0x98] sm:$0xff] }
 0xfd0   :  { %v3132_v42 = vpop.f32.mrb[38].mxu0 }
 0xfd1   :  { %v4559_v29 = vpop.f32.mrb[39].mxu0  ;;  %4587 = vmatprep.mubr.msk.f32.mxu0 %vm186_vm2, %v3132_v42 }
 0xfd2   :  { %v4719_v29 = vpack.c.bf16 %v4139_v40, %v4138_v39 }
 0xfd4   :  { %v3208_v44 = vpop.f32.mrb[24].mxu1 }
 0xfd5   :  { %v4564_v45 = vpop.f32.mrb[25].mxu1  ;;  %4588 = vmatmul.mubr.msk.f32.vlgmr.msra.gmra.mrb[44].mxu0 %vm186_vm2, %v3208_v44  ;;  %v4141_v44 = vld [vmem:[%s5646_s2 + $0xa8] sm:$0xff] }
 0xfd6   :  { %4592 = vmatprep.mubr.msk.f32.mxu0 %vm186_vm2, %v2980_v36  ;;  %4591 = vmatpush3.msra.mxu0 %v3603_v35  ;;  %v4142_v45 = vld [vmem:[%s5646_s2 + $0xb0] sm:$0xff] }
 0xfd7   :  { %4595 = vmatprep.subr.mxu0 %v3688_v46 }
 0xfd8   :  { %v3284_v21 = vpop.f32.mrb[40].mxu0  ;;  %v3360_v47 = vpop.f32.mrb[26].mxu1 }
 0xfd9   :  { %v4569_v53 = vpop.f32.mrb[41].mxu0  ;;  %v4574_v20 = vpop.f32.mrb[27].mxu1 }
 0xfda   :  { %v4144_v53 = vld [vmem:[%s5646_s2 + $0xc0] sm:$0xff]  ;;  %v4145_v20 = vld [vmem:[%s5646_s2 + $0xc8] sm:$0xff] }
 0xfdd   :  { %4593 = vmatmul.mubr.msk.f32.vlgmr.msra.gmra.mrb[44].mxu0 %vm186_vm2, %v3056_v43 }
 0xfde   :  { %4597 = vmatprep.mubr.msk.f32.mxu0 %vm186_vm2, %v3284_v21  ;;  %4596 = vmatpush3.msra.mxu0 %v3688_v46  ;;  %v4723_v46 = vpack.c.bf16 %v4141_v44, %v4140_v48  ;;  %v4143_v21 = vld [vmem:[%s5646_s2 + $0xb8] sm:$0xff] }
 0xfdf   :  { %4600 = vmatprep.subr.mxu0 %v3775_v55 }
 0xfe5   :  { %4598 = vmatmul.mubr.msk.f32.vlgmr.msra.gmra.mrb[44].mxu0 %vm186_vm2, %v3360_v47  ;;  %v4727_v47 = vpack.c.bf16 %v4143_v21, %v4142_v45 }
 0xfe6   :  { %4601 = vmatpush3.msra.mxu0 %v3775_v55  ;;  %v4731_v55 = vpack.c.bf16 %v4145_v20, %v4144_v53 }
0x1009   :  { %v3512_v58 = vpop.f32.mrb[28].mxu1 }
0x100a   :  { %v4584_v61 = vpop.f32.mrb[29].mxu1 }
0x100b   :  { %v4147_v61 = vld [vmem:[%s5646_s2 + $0xd8] sm:$0xff] }
0x1011   :  { %v3436_v62 = vpop.f32.mrb[42].mxu0 }
0x1012   :  { %v4579_v63 = vpop.f32.mrb[43].mxu0  ;;  %4602 = vmatprep.mubr.msk.f32.mxu0 %vm186_vm2, %v3436_v62 }
0x1013   :  { %4603 = vmatmul.mubr.msk.f32.vlgmr.msra.gmra.mrb[44].mxu0 %vm186_vm2, %v3512_v58  ;;  %v4146_v58 = vld [vmem:[%s5646_s2 + $0xd0] sm:$0xff]  ;;  %v4148_v63 = vld [vmem:[%s5646_s2 + $0xe0] sm:$0xff] }
0x1014   :  { %v4735_v62 = vpack.c.bf16 %v4147_v61, %v4146_v58 }
0x10e6   :  { %v4604_v3 = vpop.f32.mrb[44].mxu0 }
0x10e7   :  { %v3865_v5 = vadd.f32 %v4604_v3, %v3863_v2  ;;  %v3849_v41 = vpop.f32.mrb[45].mxu0 }
0x10e8   :  { %v3864_v27 = vadd.f32 %v3863_v2, %v3849_v41  ;;  %v4149_v2 = vld [vmem:[%s5646_s2 + $0xe8] sm:$0xff]  ;;  %v4151_v41 = vld [vmem:[%s5646_s2 + $0xf8] sm:$0xff] }
0x10e9   :  { %v5541_v1 = vadd.f32 %v3865_v5, %v5287_v37  ;;  %v4739_v3 = vpack.c.bf16 %v4149_v2, %v4148_v63  ;;  %v4150_v5 = vld [vmem:[%s5646_s2 + $0xf0] sm:$0xff]  ;;  %s4882_s2 = smov [#allocation2]  }
0x10ea   :  { %v5544_v7 = vadd.f32 %v3864_v27, %v5290_v38  ;;  %v4743_v27 = vpack.c.bf16 %v4151_v41, %v4150_v5  ;;  %s4081_s19 = sshll.u32 %s4882_s2, 4  ;;  %s4082_s19 = int_to_ptr.vmem [resolvable:$true] %s4081_s19 }
0x10eb   :  { %v3871_v25 = vsel %vm45_vm0, %v5541_v1, 0.0  ;;  %s4850_s1 = scalar_lea.vmem %s4082_s19, 256  ;;  %p4855_p1 = scmp.lt.s32.totalorder %s4082_s19, %s4082_s19 }
0x10ec   :  { %3872 = vadd.xlane.f32.xlu1 %v3871_v25  ;;  %v3868_v54 = vsel %vm45_vm0, %v5544_v7, 0.0  ;;  %v3909_v25 = vrot.slane %v5328_v6, %v1881_v31  ;;  %p4851_p0 = scmp.ne.s32.totalorder %s4082_s19, %s4850_s1  ;;  %p4856_p2 = scmp.lt.s32.totalorder %s4850_s1, %s4850_s1 }
0x10ed   :  { %3869 = vadd.xlane.f32.xlu0 %v3868_v54 }
0x10ee   :  { %p4857_p3 = por %p4856_p2, %p4855_p1 }
0x10f0   :  { %p4858_p4 = pnand %p4857_p3, %p4851_p0 }
0x1179   :  { %v3873_v57 = vpop.xlane.xlu1 %3872 }
0x117a   :  { %v3875_v49 = vmul.f32 0.03125, %v3873_v57  ;;  %v3870_v59 = vpop.xlane.xlu0 %3869 }
0x117b   :  { %v3874_v4 = vmul.f32 0.03125, %v3870_v59 }
0x117c   :  { %v3877_v8 = vsub.f32 %v5541_v1, %v3875_v49 }
0x117d   :  { %v3876_v37 = vsub.f32 %v5544_v7, %v3874_v4 }
0x117e   :  { %v3879_v10 = vmul.f32 %v3877_v8, %v3877_v8 }
0x117f   :  { %v3878_v50 = vmul.f32 %v3876_v37, %v3876_v37 }
0x1180   :  { %v3883_v12 = vsel %vm45_vm0, %v3879_v10, 0.0 }
0x1181   :  { %v3880_v38 = vsel %vm45_vm0, %v3878_v50, 0.0 }
0x1182   :  { %3881 = vadd.xlane.f32.xlu0 %v3880_v38 }
0x1186   :  { %3884 = vadd.xlane.f32.xlu0 %v3883_v12 }
0x120f   :  { %v3882_v22 = vpop.xlane.xlu0 %3881 }
0x1210   :  { %v3886_v23 = vmul.f32 0.03125, %v3882_v22 }
0x1212   :  { %v3888_v30 = vadd.f32 1e-05, %v3886_v23 }
0x1213   :  { %v3885_v24 = vpop.xlane.xlu0 %3884 }
0x1214   :  { %4846 = vrsqrt.f32 %v3888_v30  ;;  %v3887_v0 = vmul.f32 0.03125, %v3885_v24 }
0x1216   :  { %v3889_v32 = vadd.f32 1e-05, %v3887_v0 }
0x1218   :  { %4848 = vrsqrt.f32 %v3889_v32 }
0x121e   :  { %v4847_v15 = vpop.eup %4846 }
0x121f   :  { %v3892_v18 = vmul.f32 %v4847_v15, %v3876_v37  ;;  %v3996_v37 = vrot.slane %v5328_v6, %v1968_v16 }
0x1221   :  { %v3898_v34 = vmul.f32 %v3897_v14, %v3892_v18 }
0x1222   :  { %v4849_v35 = vpop.eup %4848 }
0x1223   :  { %v3893_v43 = vmul.f32 %v4849_v35, %v3877_v8  ;;  %v3904_v36 = vadd.f32 %v3903_v33, %v3898_v34 }
0x1225   :  { %v3899_v42 = vmul.f32 %v3897_v14, %v3893_v43  ;;  %4613 = vmatprep.mubr.msk.f32.mxu1 %vm45_vm0, %v3904_v36 }
0x1227   :  { %v3905_v9 = vadd.f32 %v3903_v33, %v3899_v42 }
0x1229   :  { %4614 = vmatmul.mubr.msk.f32.vlgmr.msra.gmra.mrb[30].mxu1 %vm45_vm0, %v3905_v9 }
0x122a   :  { %4718 = vmatpush3.bf16.msra.mxu1 %v4715_v28 }
0x122b   :  { %4720 = vmatprep.subr.bf16.mxu1 %v4719_v29 }
0x122e   :  { %4722 = vmatpush3.bf16.msra.mxu1 %v4719_v29 }
0x122f   :  { %4724 = vmatprep.subr.bf16.mxu1 %v4723_v46 }
0x1232   :  { %4726 = vmatpush3.bf16.msra.mxu1 %v4723_v46 }
0x1233   :  { %4728 = vmatprep.subr.bf16.mxu1 %v4727_v47 }
0x1236   :  { %4730 = vmatpush3.bf16.msra.mxu1 %v4727_v47 }
0x1237   :  { %4732 = vmatprep.subr.bf16.mxu1 %v4731_v55 }
0x123a   :  { %4734 = vmatpush3.bf16.msra.mxu1 %v4731_v55 }
0x123b   :  { %4736 = vmatprep.subr.bf16.mxu1 %v4735_v62 }
0x123e   :  { %4738 = vmatpush3.bf16.msra.mxu1 %v4735_v62 }
0x123f   :  { %4740 = vmatprep.subr.bf16.mxu1 %v4739_v3 }
0x1242   :  { %4742 = vmatpush3.bf16.msra.mxu1 %v4739_v3 }
0x1243   :  { %4744 = vmatprep.subr.bf16.mxu1 %v4743_v27 }
0x1246   :  { %4746 = vmatpush3.bf16.msra.mxu1 %v4743_v27 }
0x12fc   :  { %v4615_v54 = vpop.f32.mrb[30].mxu1 }
0x12fd   :  { %v3988_v57 = vadd.f32 %v4615_v54, %v3909_v25  ;;  %v3982_v49 = vpop.f32.mrb[31].mxu1 }
0x12fe   :  { %v3983_v59 = vadd.f32 %v3982_v49, %v3909_v25 }
0x12ff   :  { %v3992_v8 = vmax.f32 %v3988_v57, 0.0 }
0x1300   :  { %v3991_v4 = vmax.f32 %v3983_v59, 0.0 }
0x1302   :  { %4648 = vmatprep.mubr.f32.mxu1 %v3991_v4 }
0x1303   :  { %4649 = vmatmul.mubr.f32.vlgmr.msra.gmra.mrb[32].mxu1 %v3992_v8 }
0x13d6   :  { %v4650_v50 = vpop.f32.mrb[32].mxu1 }
0x13d7   :  { %v4069_v38 = vadd.f32 %v4650_v50, %v3996_v37  ;;  %v4063_v10 = vpop.f32.mrb[33].mxu1 }
0x13d8   :  { %v4064_v12 = vadd.f32 %v4063_v10, %v3996_v37 }
0x13d9   :  { %v4073_v31 = vadd.f32 %v4069_v38, %v5541_v1 }
0x13da   :  { %v4072_v52 = vadd.f32 %v4064_v12, %v5544_v7 }
0x13db   :  { %4075 = vst.msk [vmem:[#allocation2 + $0x8] sm:$0xff] %vm45_vm0, %v4073_v31 }
0x13dc   :  { %4074 = vst.msk [vmem:[#allocation2] sm:$0xff] %vm45_vm0, %v4072_v52 }
0x13dd   :  { %4861 = shalt.err (!%p4858_p4)
}
0x13de   :  { %s4862_s22 = scalar_lea.hbm %s5648_s4, 256 }
0x13df   :  { %p4863_p5 = scmp.ne.s32.totalorder %s5648_s4, %s4862_s22  ;;  %p4866_p6 = scmp.lt.u32.totalorder %s4862_s22, %s5648_s4 }
0x13e1   :  { %p4868_p7 = pnand %p4866_p6, %p4863_p5 }
0x13e3   :  { %4871 = shalt.err (!%p4868_p7)
}
0x13e4   :  { %s4883_s27 = smov 128   ;;  %s4884_s8 = smov 8  }
0x13e5   :  { %4087 = dma.vmem_to_hbm [thread:$0]  %s4082_s19, 256, %s5648_s4, [#allocation3], %s4883_s27, %s4883_s27, %s4884_s8  }
0x13e6   :  { %4872 = dma.done.wait [#allocation3], 256  }
0x13e7   :  { %4873 = vsyncadd [#allocation3], 4294967040 }
0x13e8   :  { %4091 = vsyncpa [#allocation3], 1 }

</bundles_post_ra>
